<compile_context>
chip_gen: v6e
topology: v6e:2x2x1
jax: 0.10.0
libtpu: 0.0.40
codegen_flags: <defaults>
</compile_context>

<pallas_src>
import jax
import jax.numpy as jnp
from jax.experimental import pallas as pl
from jax.experimental.pallas import tpu as pltpu

SELU_ALPHA = 1.6732632423543772
SELU_SCALE = 1.0507009873554805
HI = jax.lax.Precision.HIGHEST


def _selu(x):
    return SELU_SCALE * jnp.where(x > 0, x, SELU_ALPHA * (jnp.exp(x) - 1.0))


def _round_up(x, m):
    return ((x + m - 1) // m) * m


def _model_kernel(feat_ref, wx_ref, wh_ref, wt_ref, bias_ref, out_ref):
    """Fused forward pass: 5 MXU matmuls, no in-kernel loops.

    Packed layout (PP = round_up(7*2H, 128), HP = round_up(2H, 128), all pads = 0):
      wx   (D,  PP+HP): [:, :PP] = 7 branch layer-1 weights lane-concatenated
                        [:, PP:] = fc8 weight rows acting on `features`
      wh   (PP, PP+HP): [:, :PP] = block-diagonal of the 7 branch layer-2 weights
                        [:, PP:] = Wr_blockdiag @ W8_regression_rows (folded at init)
      wt   (HP, HP+C):  [:, :HP] = fc9 weight, [:, HP:] = classifier weight
      bias (4,  PP+HP): row0 = [branch L1 biases | fc8 bias + folded regr. biases]
                        row1 = branch L2 biases, row2 = fc9 bias, row3 = classifier bias
    """
    ppad = wh_ref.shape[0]          # padded width of the 7 concatenated branches
    hp = wx_ref.shape[1] - ppad     # padded hidden width (>= 2*hidden_size)
    c = out_ref.shape[1]

    x = feat_ref[...]                                                      # (B, D)

    # Stage 1: 7 branch layer-1 matmuls + fc8 feature matmul, one lane-dense MXU op.
    xw = jnp.dot(x, wx_ref[...], preferred_element_type=jnp.float32) + bias_ref[0:1, :]
    h1 = _selu(xw[:, :ppad])        # (B, PP); padded lanes stay 0 (selu(0) = 0)
    pre8 = xw[:, ppad:]             # (B, HP); = x @ W8_feat + b8 + br @ W8_reg

    # Stage 2: 7 branch layer-2 matmuls as one block-diagonal matmul.
    h2 = _selu(
        jnp.dot(h1, wh_ref[:, :ppad], preferred_element_type=jnp.float32)
        + bias_ref[1:2, :ppad]
    )

    # Regressions + concat + fc8, folded into one matmul:
    #   sum_i (h2_i . wr_i) * w8r_i  ==  h2 @ (Wr_blockdiag @ W8_reg)
    h8 = _selu(pre8 + jnp.dot(h2, wh_ref[:, ppad:], preferred_element_type=jnp.float32))

    # fc9 + classifier.
    h9 = _selu(
        jnp.dot(h8, wt_ref[:, :hp], preferred_element_type=jnp.float32)
        + bias_ref[2:3, :hp]
    )
    out_ref[...] = (
        jnp.dot(h9, wt_ref[:, hp:], preferred_element_type=jnp.float32)
        + bias_ref[3:4, :c]
    )


def model_forward(features, packed):
    B = features.shape[0]
    HP = packed["wt"].shape[0]
    C = packed["wt"].shape[1] - HP
    vmem = pl.BlockSpec(memory_space=pltpu.MemorySpace.VMEM)
    return pl.pallas_call(
        _model_kernel,
        out_shape=jax.ShapeDtypeStruct((B, C), jnp.float32),
        in_specs=[vmem] * 5,
        out_specs=vmem,
    )(features, packed["wx"], packed["wh"], packed["wt"], packed["bias"])


def init_torch_like_params(key, input_size, hidden_size, category_size):
    """Parameters in the same logical layout as the PyTorch module (pre-transposed)."""
    H2 = hidden_size * 2
    D = input_size
    ks = jax.random.split(key, 12)
    s = 0.1

    def u(k, shape):
        return s * jax.random.normal(k, shape, dtype=jnp.float32)

    return {
        "w1": u(ks[0], (7, D, H2)), "b1": u(ks[1], (7, H2)),      # branch layer 1
        "w2": u(ks[2], (7, H2, H2)), "b2": u(ks[3], (7, H2)),     # branch layer 2
        "wr": u(ks[4], (7, H2)), "br": u(ks[5], (7,)),            # regression heads
        "w8": u(ks[6], (D + 7, H2)), "b8": u(ks[7], (H2,)),       # fc8 (on concat)
        "w9": u(ks[8], (H2, H2)), "b9": u(ks[9], (H2,)),          # fc9
        "wc": u(ks[10], (H2, category_size)), "bc": u(ks[11], (category_size,)),
    }


def pack_params(p):
    """Fold / pad / pack torch-like params into the 4 kernel refs (done once, at init)."""
    D, H2 = p["w1"].shape[1], p["w1"].shape[2]
    C = p["wc"].shape[1]
    P = 7 * H2
    PP = _round_up(P, 128)
    HP = _round_up(H2, 128)
    f32 = jnp.float32

    # Stage-1 weights: [branch layer-1 lane-concat | fc8 feature part], zero-padded.
    w1cat = jnp.concatenate([p["w1"][i] for i in range(7)], axis=1)           # (D, P)
    w8f = p["w8"][:D]                                                         # (D, H2)
    wx = jnp.zeros((D, PP + HP), f32)
    wx = wx.at[:, :P].set(w1cat).at[:, PP:PP + H2].set(w8f)

    # Stage-2 weights: [block-diag branch layer-2 | folded regression->fc8 matrix].
    w2bd = jax.scipy.linalg.block_diag(*[p["w2"][i] for i in range(7)])       # (P, P)
    wr_bd = jax.scipy.linalg.block_diag(*[p["wr"][i][:, None] for i in range(7)])  # (P, 7)
    w8r = p["w8"][D:]                                                         # (7, H2)
    w_reg8 = jnp.dot(wr_bd, w8r, precision=HI)                                # (P, H2)
    wh = jnp.zeros((PP, PP + HP), f32)
    wh = wh.at[:P, :P].set(w2bd).at[:P, PP:PP + H2].set(w_reg8)

    # Tail weights: [fc9 | classifier], rows padded to HP.
    wt = jnp.zeros((HP, HP + C), f32)
    wt = wt.at[:H2, :H2].set(p["w9"]).at[:H2, HP:].set(p["wc"])

    # All biases packed into one (4, PP+HP) array.
    b8_eff = p["b8"] + jnp.dot(p["br"], w8r, precision=HI)    # fold regression biases
    b1cat = jnp.concatenate([p["b1"][i] for i in range(7)])
    b2cat = jnp.concatenate([p["b2"][i] for i in range(7)])
    bias = jnp.zeros((4, PP + HP), f32)
    bias = bias.at[0, :P].set(b1cat).at[0, PP:PP + H2].set(b8_eff)
    bias = bias.at[1, :P].set(b2cat)
    bias = bias.at[2, :H2].set(p["b9"])
    bias = bias.at[3, :C].set(p["bc"])

    return {"wx": wx, "wh": wh, "wt": wt, "bias": bias}


def reference_forward(features, p):
    """Pure-JAX reference mirroring the PyTorch forward (eval mode)."""
    def lin(x, w, b):
        return jnp.dot(x, w, precision=HI) + b

    x = features
    regs = []
    for i in range(7):
        h = _selu(lin(x, p["w1"][i], p["b1"][i]))
        h = _selu(lin(h, p["w2"][i], p["b2"][i]))
        regs.append(jnp.dot(h, p["wr"][i], precision=HI)[:, None] + p["br"][i])
    new_features = jnp.concatenate([x] + regs, axis=1)                 # (B, D+7)
    h8 = _selu(lin(new_features, p["w8"], p["b8"]))
    h9 = _selu(lin(h8, p["w9"], p["b9"]))
    return lin(h9, p["wc"], p["bc"])


if __name__ == "__main__":
    batch = 8
    input_size = 16
    hidden_size = 32
    category_size = 4

    key = jax.random.PRNGKey(0)
    k_feat, k_params = jax.random.split(key)
    features = jax.random.normal(k_feat, (batch, input_size), dtype=jnp.float32)
    tparams = init_torch_like_params(k_params, input_size, hidden_size, category_size)
    packed = pack_params(tparams)

    logits = model_forward(features, packed)
    jax.block_until_ready(logits)

    ref = reference_forward(features, tparams)
    assert logits.shape == (batch, category_size)
    assert jnp.allclose(logits, ref, atol=5e-4, rtol=5e-4), "mismatch vs JAX reference"

    print("KERNEL_OK")
</pallas_src>

<mosaic_0001>
module attributes {stable_mosaic.version = 11 : i64} {
  func.func @_model_kernel(%arg0: memref<8x16xf32, #tpu.memory_space<vmem>>, %arg1: memref<16x640xf32, #tpu.memory_space<vmem>>, %arg2: memref<512x640xf32, #tpu.memory_space<vmem>>, %arg3: memref<128x132xf32, #tpu.memory_space<vmem>>, %arg4: memref<4x640xf32, #tpu.memory_space<vmem>>, %arg5: memref<8x4xf32, #tpu.memory_space<vmem>>) attributes {dimension_semantics = [], scalar_prefetch = 0 : i64, scratch_operands = 0 : i64, tpu.core_type = #tpu.core_type<tc>} {
    %c0 = arith.constant 0 : index
    %c0_0 = arith.constant 0 : index
    %0 = vector.load %arg0[%c0, %c0_0] : memref<8x16xf32, #tpu.memory_space<vmem>>, vector<8x16xf32>
    %c0_1 = arith.constant 0 : index
    %c0_2 = arith.constant 0 : index
    %1 = vector.load %arg1[%c0_1, %c0_2] : memref<16x640xf32, #tpu.memory_space<vmem>>, vector<16x640xf32>
    %cst = arith.constant dense<0.000000e+00> : vector<8x640xf32>
    %2 = tpu.matmul %0, %1, %cst {dimension_numbers = #tpu.dot_dimension_numbers<[1], [0], [0], [1], [0, 0, 1, 1], [], []>} : vector<8x16xf32>, vector<16x640xf32>, vector<8x640xf32> -> vector<8x640xf32>
    %c0_3 = arith.constant 0 : index
    %c0_4 = arith.constant 0 : index
    %3 = vector.load %arg4[%c0_3, %c0_4] : memref<4x640xf32, #tpu.memory_space<vmem>>, vector<1x640xf32>
    %4 = vector.broadcast %3 : vector<1x640xf32> to vector<8x640xf32>
    %5 = arith.addf %2, %4 : vector<8x640xf32>
    %6 = vector.extract_strided_slice %5 {offsets = [0, 0], sizes = [8, 512], strides = [1, 1]} : vector<8x640xf32> to vector<8x512xf32>
    %cst_5 = arith.constant 0.000000e+00 : f32
    %7 = vector.broadcast %cst_5 : f32 to vector<8x512xf32>
    %8 = arith.cmpf ogt, %6, %7 : vector<8x512xf32>
    %9 = math.exp %6 : vector<8x512xf32>
    %cst_6 = arith.constant 1.000000e+00 : f32
    %10 = vector.broadcast %cst_6 : f32 to vector<8x512xf32>
    %11 = arith.subf %9, %10 : vector<8x512xf32>
    %cst_7 = arith.constant 1.67326319 : f32
    %12 = vector.broadcast %cst_7 : f32 to vector<8x512xf32>
    %13 = arith.mulf %12, %11 : vector<8x512xf32>
    %14 = arith.select %8, %6, %13 : vector<8x512xi1>, vector<8x512xf32>
    %cst_8 = arith.constant 1.05070102 : f32
    %15 = vector.broadcast %cst_8 : f32 to vector<8x512xf32>
    %16 = arith.mulf %15, %14 : vector<8x512xf32>
    %17 = vector.extract_strided_slice %5 {offsets = [0, 512], sizes = [8, 128], strides = [1, 1]} : vector<8x640xf32> to vector<8x128xf32>
    %c0_9 = arith.constant 0 : index
    %c0_10 = arith.constant 0 : index
    %18 = vector.load %arg2[%c0_9, %c0_10] : memref<512x640xf32, #tpu.memory_space<vmem>>, vector<512x512xf32>
    %cst_11 = arith.constant dense<0.000000e+00> : vector<8x512xf32>
    %19 = tpu.matmul %16, %18, %cst_11 {dimension_numbers = #tpu.dot_dimension_numbers<[1], [0], [0], [1], [0, 0, 1, 1], [], []>} : vector<8x512xf32>, vector<512x512xf32>, vector<8x512xf32> -> vector<8x512xf32>
    %c1 = arith.constant 1 : index
    %c0_12 = arith.constant 0 : index
    %20 = vector.load %arg4[%c1, %c0_12] : memref<4x640xf32, #tpu.memory_space<vmem>>, vector<1x512xf32>
    %21 = vector.broadcast %20 : vector<1x512xf32> to vector<8x512xf32>
    %22 = arith.addf %19, %21 : vector<8x512xf32>
    %cst_13 = arith.constant 0.000000e+00 : f32
    %23 = vector.broadcast %cst_13 : f32 to vector<8x512xf32>
    %24 = arith.cmpf ogt, %22, %23 : vector<8x512xf32>
    %25 = math.exp %22 : vector<8x512xf32>
    %cst_14 = arith.constant 1.000000e+00 : f32
    %26 = vector.broadcast %cst_14 : f32 to vector<8x512xf32>
    %27 = arith.subf %25, %26 : vector<8x512xf32>
    %cst_15 = arith.constant 1.67326319 : f32
    %28 = vector.broadcast %cst_15 : f32 to vector<8x512xf32>
    %29 = arith.mulf %28, %27 : vector<8x512xf32>
    %30 = arith.select %24, %22, %29 : vector<8x512xi1>, vector<8x512xf32>
    %cst_16 = arith.constant 1.05070102 : f32
    %31 = vector.broadcast %cst_16 : f32 to vector<8x512xf32>
    %32 = arith.mulf %31, %30 : vector<8x512xf32>
    %c0_17 = arith.constant 0 : index
    %c512 = arith.constant 512 : index
    %33 = vector.load %arg2[%c0_17, %c512] : memref<512x640xf32, #tpu.memory_space<vmem>>, vector<512x128xf32>
    %cst_18 = arith.constant dense<0.000000e+00> : vector<8x128xf32>
    %34 = tpu.matmul %32, %33, %cst_18 {dimension_numbers = #tpu.dot_dimension_numbers<[1], [0], [0], [1], [0, 0, 1, 1], [], []>} : vector<8x512xf32>, vector<512x128xf32>, vector<8x128xf32> -> vector<8x128xf32>
    %35 = arith.addf %17, %34 : vector<8x128xf32>
    %cst_19 = arith.constant 0.000000e+00 : f32
    %36 = vector.broadcast %cst_19 : f32 to vector<8x128xf32>
    %37 = arith.cmpf ogt, %35, %36 : vector<8x128xf32>
    %38 = math.exp %35 : vector<8x128xf32>
    %cst_20 = arith.constant 1.000000e+00 : f32
    %39 = vector.broadcast %cst_20 : f32 to vector<8x128xf32>
    %40 = arith.subf %38, %39 : vector<8x128xf32>
    %cst_21 = arith.constant 1.67326319 : f32
    %41 = vector.broadcast %cst_21 : f32 to vector<8x128xf32>
    %42 = arith.mulf %41, %40 : vector<8x128xf32>
    %43 = arith.select %37, %35, %42 : vector<8x128xi1>, vector<8x128xf32>
    %cst_22 = arith.constant 1.05070102 : f32
    %44 = vector.broadcast %cst_22 : f32 to vector<8x128xf32>
    %45 = arith.mulf %44, %43 : vector<8x128xf32>
    %c0_23 = arith.constant 0 : index
    %c0_24 = arith.constant 0 : index
    %46 = vector.load %arg3[%c0_23, %c0_24] : memref<128x132xf32, #tpu.memory_space<vmem>>, vector<128x128xf32>
    %cst_25 = arith.constant dense<0.000000e+00> : vector<8x128xf32>
    %47 = tpu.matmul %45, %46, %cst_25 {dimension_numbers = #tpu.dot_dimension_numbers<[1], [0], [0], [1], [0, 0, 1, 1], [], []>} : vector<8x128xf32>, vector<128x128xf32>, vector<8x128xf32> -> vector<8x128xf32>
    %c2 = arith.constant 2 : index
    %c0_26 = arith.constant 0 : index
    %48 = vector.load %arg4[%c2, %c0_26] : memref<4x640xf32, #tpu.memory_space<vmem>>, vector<1x128xf32>
    %49 = vector.broadcast %48 : vector<1x128xf32> to vector<8x128xf32>
    %50 = arith.addf %47, %49 : vector<8x128xf32>
    %cst_27 = arith.constant 0.000000e+00 : f32
    %51 = vector.broadcast %cst_27 : f32 to vector<8x128xf32>
    %52 = arith.cmpf ogt, %50, %51 : vector<8x128xf32>
    %53 = math.exp %50 : vector<8x128xf32>
    %cst_28 = arith.constant 1.000000e+00 : f32
    %54 = vector.broadcast %cst_28 : f32 to vector<8x128xf32>
    %55 = arith.subf %53, %54 : vector<8x128xf32>
    %cst_29 = arith.constant 1.67326319 : f32
    %56 = vector.broadcast %cst_29 : f32 to vector<8x128xf32>
    %57 = arith.mulf %56, %55 : vector<8x128xf32>
    %58 = arith.select %52, %50, %57 : vector<8x128xi1>, vector<8x128xf32>
    %cst_30 = arith.constant 1.05070102 : f32
    %59 = vector.broadcast %cst_30 : f32 to vector<8x128xf32>
    %60 = arith.mulf %59, %58 : vector<8x128xf32>
    %c0_31 = arith.constant 0 : index
    %c128 = arith.constant 128 : index
    %61 = vector.load %arg3[%c0_31, %c128] : memref<128x132xf32, #tpu.memory_space<vmem>>, vector<128x4xf32>
    %cst_32 = arith.constant dense<0.000000e+00> : vector<8x4xf32>
    %62 = tpu.matmul %60, %61, %cst_32 {dimension_numbers = #tpu.dot_dimension_numbers<[1], [0], [0], [1], [0, 0, 1, 1], [], []>} : vector<8x128xf32>, vector<128x4xf32>, vector<8x4xf32> -> vector<8x4xf32>
    %c3 = arith.constant 3 : index
    %c0_33 = arith.constant 0 : index
    %63 = vector.load %arg4[%c3, %c0_33] : memref<4x640xf32, #tpu.memory_space<vmem>>, vector<1x4xf32>
    %64 = vector.broadcast %63 : vector<1x4xf32> to vector<8x4xf32>
    %65 = arith.addf %62, %64 : vector<8x4xf32>
    %c0_34 = arith.constant 0 : index
    %c0_35 = arith.constant 0 : index
    %66 = vector.load %arg5[%c0_34, %c0_35] : memref<8x4xf32, #tpu.memory_space<vmem>>, vector<8x4xf32>
    tpu.vector_store %arg5[%c0_34, %c0_35], %65 {strides = array<i32>} : memref<8x4xf32, #tpu.memory_space<vmem>>, vector<8x4xf32>,
    return
  }
}

</mosaic_0001>

<bundles_post_ra>
// kernel: tpu_custom_call.1
= control target key start
LH: loop header
LB: loop body
LE: loop exit
PB: predicated region body
PF: predicated region fallthrough
CT: control target
= control target key end

     0   :  { %10 = vsyncpa [#allocation3], 0  ;;  %s1896_s0 = inlined_call_operand.hbm [shape: f32[8,16], index: 0, kind: input, shape index: {}]   ;;  %s1897_s1 = inlined_call_operand.hbm [shape: f32[16,640], index: 1, kind: input, shape index: {}]   ;;  %s1898_s2 = inlined_call_operand.hbm [shape: f32[512,640], index: 2, kind: input, shape index: {}]   ;;  %s1899_s3 = inlined_call_operand.vmem [shape: f32[128,132], index: 3, kind: input, shape index: {}]   ;;  %s1900_s4 = inlined_call_operand.hbm [shape: f32[4,640], index: 4, kind: input, shape index: {}]   ;;  %s1901_s5 = inlined_call_operand.vmem [shape: f32[8,4], index: 5, kind: output, shape index: {}]  }
   0x1   :  { %11 = vsyncpa [#allocation5], 0 }
   0x2   :  { %12 = vsyncpa [#allocation8], 0  ;;  %s1668_s18 = smov [#allocation4]  }
   0x3   :  { %s28_s19 = sshll.u32 %s1668_s18, 4  ;;  %s29_s19 = int_to_ptr.vmem [resolvable:$true] %s28_s19 }
   0x4   :  { %s1590_s20 = scalar_lea.vmem %s29_s19, 1280  ;;  %p1595_p1 = scmp.lt.s32.totalorder %s29_s19, %s29_s19 }
   0x5   :  { %p1591_p0 = scmp.ne.s32.totalorder %s29_s19, %s1590_s20  ;;  %p1596_p2 = scmp.lt.s32.totalorder %s1590_s20, %s1590_s20 }
   0x7   :  { %p1597_p3 = por %p1596_p2, %p1595_p1 }
   0x9   :  { %p1598_p4 = pnand %p1597_p3, %p1591_p0 }
   0xb   :  { %1601 = shalt.err (!%p1598_p4)
}
   0xc   :  { %s1669_s21 = smov 640   ;;  %s1670_s22 = smov 40  }
   0xd   :  { %34 = dma.hbm_to_vmem [thread:$0]  %s1897_s1, 1280, %s29_s19, [#allocation5], %s1669_s21, %s1669_s21, %s1670_s22  }
   0xe   :  { %s1671_s25 = smov [#allocation2]   ;;  %s1672_s27 = smov [#allocation6]  }
   0xf   :  { %s19_s26 = sshll.u32 %s1671_s25, 4  ;;  %s40_s28 = sshll.u32 %s1672_s27, 4  ;;  %s20_s26 = int_to_ptr.vmem [resolvable:$true] %s19_s26  ;;  %s41_s28 = int_to_ptr.vmem [resolvable:$true] %s40_s28 }
  0x10   :  { %s1610_s29 = scalar_lea.vmem %s20_s26, 128  ;;  %p1615_p6 = scmp.lt.s32.totalorder %s20_s26, %s20_s26 }
  0x11   :  { %p1611_p5 = scmp.ne.s32.totalorder %s20_s26, %s1610_s29  ;;  %p1616_p7 = scmp.lt.s32.totalorder %s1610_s29, %s1610_s29 }
  0x13   :  { %p1617_p8 = por %p1616_p7, %p1615_p6 }
  0x15   :  { %p1618_p9 = pnand %p1617_p8, %p1611_p5 }
  0x17   :  { %1621 = shalt.err (!%p1618_p9)
}
  0x18   :  { %22 = dma.hbm_to_vmem [thread:$0]  %s1896_s0, 128, %s20_s26, [#allocation3]  }
  0x19   :  { %s1630_s7 = scalar_lea.vmem %s41_s28, 40960  ;;  %p1635_p11 = scmp.lt.s32.totalorder %s41_s28, %s41_s28 }
  0x1a   :  { %p1631_p10 = scmp.ne.s32.totalorder %s41_s28, %s1630_s7  ;;  %p1636_p12 = scmp.lt.s32.totalorder %s1630_s7, %s1630_s7 }
  0x1c   :  { %p1637_p13 = por %p1636_p12, %p1635_p11 }
  0x1e   :  { %p1638_p0 = pnand %p1637_p13, %p1631_p10 }
  0x20   :  { %1641 = shalt.err (!%p1638_p0)
}
  0x21   :  { %46 = dma.hbm_to_vmem [thread:$0]  %s1898_s2, 40960, %s41_s28, [#allocation5], %s1669_s21, %s1669_s21, %s1670_s22  }
  0x22   :  { %s1673_s9 = smov [#allocation7]  }
  0x23   :  { %s55_s10 = sshll.u32 %s1673_s9, 4  ;;  %s56_s10 = int_to_ptr.vmem [resolvable:$true] %s55_s10 }
  0x24   :  { %s1650_s11 = scalar_lea.vmem %s56_s10, 320  ;;  %p1655_p2 = scmp.lt.s32.totalorder %s56_s10, %s56_s10 }
  0x25   :  { %p1651_p1 = scmp.ne.s32.totalorder %s56_s10, %s1650_s11  ;;  %p1656_p3 = scmp.lt.s32.totalorder %s1650_s11, %s1650_s11 }
  0x27   :  { %p1657_p4 = por %p1656_p3, %p1655_p2 }
  0x29   :  { %p1658_p5 = pnand %p1657_p4, %p1651_p1 }
  0x2b   :  { %1661 = shalt.err (!%p1658_p5)
}
  0x2c   :  { %58 = dma.hbm_to_vmem [thread:$0]  %s1900_s4, 320, %s56_s10, [#allocation8]  }
  0x2d   :  { %1662 = dma.done.wait [#allocation3], 128  }
  0x2e   :  { %1663 = vsyncadd [#allocation3], 4294967168 }
  0x2f   :  { %1664 = dma.done.wait [#allocation5], 42240  }
  0x30   :  { %1665 = vsyncadd [#allocation5], 4294925056 }
  0x31   :  { %1666 = dma.done.wait [#allocation8], 320  }
  0x32   :  { %1667 = vsyncadd [#allocation8], 4294966976  ;;  %v1674_v0 = vmov 0.0   ;;  %v78_v1 = vld [vmem:[#allocation4 + $0x30] sm:$0xff]  ;;  %v80_v2 = vld [vmem:[#allocation4 + $0x40] sm:$0xff]  ;;  %vm109_vm0 = vcmask 130048  }
  0x33   :  { %177 = vmatprep.mubr.f32.mxu0 %v1674_v0  ;;  %248 = vmatprep.mubr.f32.mxu1 %v1674_v0  ;;  %v77_v3 = vld [vmem:[#allocation4 + $0x28] sm:$0xff]  ;;  %v79_v4 = vld [vmem:[#allocation4 + $0x38] sm:$0xff]  ;;  %v72_v7 = vld [vmem:[#allocation4] sm:$0xff]  ;;  %vm1675_vm1 = vmmov 0   ;;  %vm1345_vm12 = vcmask 31744  }
  0x34   :  { %141 = vmatprep.subr.mxu0 %v78_v1  ;;  %212 = vmatprep.subr.mxu1 %v80_v2  ;;  %v73_v5 = vld [vmem:[#allocation4 + $0x8] sm:$0xff]  ;;  %v75_v6 = vld [vmem:[#allocation4 + $0x18] sm:$0xff]  ;;  %v74_v8 = vld [vmem:[#allocation4 + $0x10] sm:$0xff] }
  0x35   :  { %142 = vmatpush1.msra.mxu0 %v77_v3  ;;  %213 = vmatpush1.msra.mxu1 %v79_v4  ;;  %v71_v9 = vld [vmem:[#allocation2] sm:$0xff]  ;;  %v81_v10 = vld [vmem:[#allocation4 + $0x48] sm:$0xff]  ;;  %v414_v11 = vld [vmem:[#allocation6 + $0x260] sm:$0xff] }
  0x36   :  { %143 = vmatprep.subr.mxu0 %v73_v5  ;;  %214 = vmatprep.subr.mxu1 %v75_v6  ;;  %v413_v12 = vld [vmem:[#allocation6 + $0x258] sm:$0xff]  ;;  %v76_v13 = vld [vmem:[#allocation4 + $0x20] sm:$0xff]  ;;  %v542_v15 = vld [vmem:[#allocation6 + $0x760] sm:$0xff] }
  0x37   :  { %144 = vmatpush1.msra.mxu0 %v72_v7  ;;  %215 = vmatpush1.msra.mxu1 %v74_v8  ;;  %v410_v14 = vld [vmem:[#allocation6 + $0x238] sm:$0xff]  ;;  %v409_v17 = vld [vmem:[#allocation6 + $0x230] sm:$0xff]  ;;  %v405_v21 = vld [vmem:[#allocation6 + $0x208] sm:$0xff] }
  0x38   :  { %1354 = vmatmul.mubr.msk.f32.vlgmr.msra.gmra.mxu0 %vm109_vm0, %v71_v9  ;;  %1355 = vmatmul.mubr.msk.f32.vlgmr.msra.gmra.mxu1 %vm109_vm0, %v71_v9  ;;  %v541_v16 = vld [vmem:[#allocation6 + $0x758] sm:$0xff]  ;;  %v406_v19 = vld [vmem:[#allocation6 + $0x210] sm:$0xff]  ;;  %v402_v23 = vld [vmem:[#allocation6 + $0x1e8] sm:$0xff] }
  0x39   :  { %1476 = vmatprep.subr.mxu0 %v1674_v0  ;;  %1480 = vmatprep.mubr.msk.f32.mxu0 %vm1675_vm1, %v1674_v0  ;;  %v538_v18 = vld [vmem:[#allocation6 + $0x738] sm:$0xff]  ;;  %v537_v20 = vld [vmem:[#allocation6 + $0x730] sm:$0xff]  ;;  %v533_v24 = vld [vmem:[#allocation6 + $0x708] sm:$0xff] }
  0x3a   :  { %1477 = vmatpush3.msra.mxu0 %v81_v10  ;;  %632 = vmatprep.subr.mxu1 %v414_v11  ;;  %v534_v22 = vld [vmem:[#allocation6 + $0x710] sm:$0xff]  ;;  %v401_v25 = vld [vmem:[#allocation6 + $0x1e0] sm:$0xff]  ;;  %v530_v26 = vld [vmem:[#allocation6 + $0x6e8] sm:$0xff] }
  0x3b   :  { %1478 = vmatprep.subr.mxu0 %v1674_v0  ;;  %633 = vmatpush1.msra.mxu1 %v413_v12  ;;  %v398_v27 = vld [vmem:[#allocation6 + $0x1c0] sm:$0xff]  ;;  %v397_v29 = vld [vmem:[#allocation6 + $0x1b8] sm:$0xff]  ;;  %v393_v33 = vld [vmem:[#allocation6 + $0x190] sm:$0xff] }
  0x3c   :  { %1479 = vmatpush3.msra.mxu0 %v76_v13  ;;  %634 = vmatprep.subr.mxu1 %v410_v14  ;;  %v529_v28 = vld [vmem:[#allocation6 + $0x6e0] sm:$0xff]  ;;  %v394_v31 = vld [vmem:[#allocation6 + $0x198] sm:$0xff]  ;;  %v390_v35 = vld [vmem:[#allocation6 + $0x170] sm:$0xff] }
  0x3d   :  { %703 = vmatprep.subr.mxu0 %v542_v15  ;;  %1481 = vmatmul.mubr.msk.f32.vlgmr.msra.gmra.mxu0 %vm109_vm0, %v71_v9  ;;  %v526_v30 = vld [vmem:[#allocation6 + $0x6c0] sm:$0xff]  ;;  %v525_v32 = vld [vmem:[#allocation6 + $0x6b8] sm:$0xff]  ;;  %v521_v36 = vld [vmem:[#allocation6 + $0x690] sm:$0xff] }
  0x3e   :  { %704 = vmatpush1.msra.mxu0 %v541_v16  ;;  %635 = vmatpush1.msra.mxu1 %v409_v17  ;;  %v522_v34 = vld [vmem:[#allocation6 + $0x698] sm:$0xff]  ;;  %v389_v37 = vld [vmem:[#allocation6 + $0x168] sm:$0xff]  ;;  %v518_v38 = vld [vmem:[#allocation6 + $0x670] sm:$0xff] }
  0x3f   :  { %705 = vmatprep.subr.mxu0 %v538_v18  ;;  %636 = vmatprep.subr.mxu1 %v406_v19  ;;  %v386_v39 = vld [vmem:[#allocation6 + $0x148] sm:$0xff]  ;;  %v385_v41 = vld [vmem:[#allocation6 + $0x140] sm:$0xff]  ;;  %v381_v45 = vld [vmem:[#allocation6 + $0x118] sm:$0xff] }
  0x40   :  { %706 = vmatpush1.msra.mxu0 %v537_v20  ;;  %637 = vmatpush1.msra.mxu1 %v405_v21  ;;  %v517_v40 = vld [vmem:[#allocation6 + $0x668] sm:$0xff]  ;;  %v382_v43 = vld [vmem:[#allocation6 + $0x120] sm:$0xff]  ;;  %v378_v47 = vld [vmem:[#allocation6 + $0xf8] sm:$0xff] }
  0x41   :  { %707 = vmatprep.subr.mxu0 %v534_v22  ;;  %638 = vmatprep.subr.mxu1 %v402_v23  ;;  %v514_v42 = vld [vmem:[#allocation6 + $0x648] sm:$0xff]  ;;  %v513_v44 = vld [vmem:[#allocation6 + $0x640] sm:$0xff]  ;;  %v509_v48 = vld [vmem:[#allocation6 + $0x618] sm:$0xff] }
  0x42   :  { %708 = vmatpush1.msra.mxu0 %v533_v24  ;;  %639 = vmatpush1.msra.mxu1 %v401_v25  ;;  %v510_v46 = vld [vmem:[#allocation6 + $0x620] sm:$0xff]  ;;  %v377_v49 = vld [vmem:[#allocation6 + $0xf0] sm:$0xff]  ;;  %v506_v50 = vld [vmem:[#allocation6 + $0x5f8] sm:$0xff] }
  0x43   :  { %709 = vmatprep.subr.mxu0 %v530_v26  ;;  %640 = vmatprep.subr.mxu1 %v398_v27  ;;  %v374_v51 = vld [vmem:[#allocation6 + $0xd0] sm:$0xff]  ;;  %v373_v53 = vld [vmem:[#allocation6 + $0xc8] sm:$0xff]  ;;  %v369_v57 = vld [vmem:[#allocation6 + $0xa0] sm:$0xff] }
  0x44   :  { %710 = vmatpush1.msra.mxu0 %v529_v28  ;;  %641 = vmatpush1.msra.mxu1 %v397_v29  ;;  %v505_v52 = vld [vmem:[#allocation6 + $0x5f0] sm:$0xff]  ;;  %v370_v55 = vld [vmem:[#allocation6 + $0xa8] sm:$0xff]  ;;  %v366_v59 = vld [vmem:[#allocation6 + $0x80] sm:$0xff] }
  0x45   :  { %711 = vmatprep.subr.mxu0 %v526_v30  ;;  %642 = vmatprep.subr.mxu1 %v394_v31  ;;  %v502_v54 = vld [vmem:[#allocation6 + $0x5d0] sm:$0xff]  ;;  %v501_v56 = vld [vmem:[#allocation6 + $0x5c8] sm:$0xff]  ;;  %v497_v60 = vld [vmem:[#allocation6 + $0x5a0] sm:$0xff] }
  0x46   :  { %712 = vmatpush1.msra.mxu0 %v525_v32  ;;  %643 = vmatpush1.msra.mxu1 %v393_v33  ;;  %v498_v58 = vld [vmem:[#allocation6 + $0x5a8] sm:$0xff]  ;;  %v365_v61 = vld [vmem:[#allocation6 + $0x78] sm:$0xff]  ;;  %v494_v62 = vld [vmem:[#allocation6 + $0x580] sm:$0xff] }
  0x47   :  { %713 = vmatprep.subr.mxu0 %v522_v34  ;;  %644 = vmatprep.subr.mxu1 %v390_v35  ;;  %v362_v63 = vld [vmem:[#allocation6 + $0x58] sm:$0xff]  ;;  %v361_v2 = vld [vmem:[#allocation6 + $0x50] sm:$0xff]  ;;  %v357_v6 = vld [vmem:[#allocation6 + $0x28] sm:$0xff] }
  0x48   :  { %714 = vmatpush1.msra.mxu0 %v521_v36  ;;  %645 = vmatpush1.msra.mxu1 %v389_v37  ;;  %v493_v1 = vld [vmem:[#allocation6 + $0x578] sm:$0xff]  ;;  %v358_v4 = vld [vmem:[#allocation6 + $0x30] sm:$0xff]  ;;  %v354_v8 = vld [vmem:[#allocation6 + $0x8] sm:$0xff] }
  0x49   :  { %715 = vmatprep.subr.mxu0 %v518_v38  ;;  %646 = vmatprep.subr.mxu1 %v386_v39  ;;  %v490_v3 = vld [vmem:[#allocation6 + $0x558] sm:$0xff]  ;;  %v489_v5 = vld [vmem:[#allocation6 + $0x550] sm:$0xff]  ;;  %v485_v9 = vld [vmem:[#allocation6 + $0x528] sm:$0xff] }
  0x4a   :  { %716 = vmatpush1.msra.mxu0 %v517_v40  ;;  %647 = vmatpush1.msra.mxu1 %v385_v41  ;;  %v486_v7 = vld [vmem:[#allocation6 + $0x530] sm:$0xff]  ;;  %v353_v10 = vld [vmem:[#allocation6] sm:$0xff]  ;;  %v482_v11 = vld [vmem:[#allocation6 + $0x508] sm:$0xff] }
  0x4b   :  { %717 = vmatprep.subr.mxu0 %v514_v42  ;;  %648 = vmatprep.subr.mxu1 %v382_v43  ;;  %v478_v12 = vld [vmem:[#allocation6 + $0x4e0] sm:$0xff]  ;;  %v477_v14 = vld [vmem:[#allocation6 + $0x4d8] sm:$0xff]  ;;  %v473_v18 = vld [vmem:[#allocation6 + $0x4b0] sm:$0xff] }
  0x4c   :  { %718 = vmatpush1.msra.mxu0 %v513_v44  ;;  %649 = vmatpush1.msra.mxu1 %v381_v45  ;;  %v481_v13 = vld [vmem:[#allocation6 + $0x500] sm:$0xff]  ;;  %v474_v16 = vld [vmem:[#allocation6 + $0x4b8] sm:$0xff]  ;;  %v601_v20 = vld [vmem:[#allocation6 + $0x9b0] sm:$0xff] }
  0x4d   :  { %719 = vmatprep.subr.mxu0 %v510_v46  ;;  %650 = vmatprep.subr.mxu1 %v378_v47  ;;  %v606_v15 = vld [vmem:[#allocation6 + $0x9e0] sm:$0xff]  ;;  %v605_v17 = vld [vmem:[#allocation6 + $0x9d8] sm:$0xff]  ;;  %v470_v21 = vld [vmem:[#allocation6 + $0x490] sm:$0xff] }
  0x4e   :  { %720 = vmatpush1.msra.mxu0 %v509_v48  ;;  %651 = vmatpush1.msra.mxu1 %v377_v49  ;;  %v602_v19 = vld [vmem:[#allocation6 + $0x9b8] sm:$0xff]  ;;  %v598_v22 = vld [vmem:[#allocation6 + $0x990] sm:$0xff]  ;;  %v469_v23 = vld [vmem:[#allocation6 + $0x488] sm:$0xff] }
  0x4f   :  { %721 = vmatprep.subr.mxu0 %v506_v50  ;;  %652 = vmatprep.subr.mxu1 %v374_v51  ;;  %v597_v24 = vld [vmem:[#allocation6 + $0x988] sm:$0xff]  ;;  %v465_v27 = vld [vmem:[#allocation6 + $0x460] sm:$0xff]  ;;  %v461_v31 = vld [vmem:[#allocation6 + $0x438] sm:$0xff] }
  0x50   :  { %722 = vmatpush1.msra.mxu0 %v505_v52  ;;  %653 = vmatpush1.msra.mxu1 %v373_v53  ;;  %v466_v25 = vld [vmem:[#allocation6 + $0x468] sm:$0xff]  ;;  %v593_v28 = vld [vmem:[#allocation6 + $0x960] sm:$0xff]  ;;  %v589_v32 = vld [vmem:[#allocation6 + $0x938] sm:$0xff] }
  0x51   :  { %723 = vmatprep.subr.mxu0 %v502_v54  ;;  %654 = vmatprep.subr.mxu1 %v370_v55  ;;  %v594_v26 = vld [vmem:[#allocation6 + $0x968] sm:$0xff]  ;;  %v462_v29 = vld [vmem:[#allocation6 + $0x440] sm:$0xff]  ;;  %v458_v33 = vld [vmem:[#allocation6 + $0x418] sm:$0xff] }
  0x52   :  { %724 = vmatpush1.msra.mxu0 %v501_v56  ;;  %655 = vmatpush1.msra.mxu1 %v369_v57  ;;  %v590_v30 = vld [vmem:[#allocation6 + $0x940] sm:$0xff]  ;;  %v586_v34 = vld [vmem:[#allocation6 + $0x918] sm:$0xff]  ;;  %v457_v35 = vld [vmem:[#allocation6 + $0x410] sm:$0xff] }
  0x53   :  { %725 = vmatprep.subr.mxu0 %v498_v58  ;;  %656 = vmatprep.subr.mxu1 %v366_v59  ;;  %v585_v36 = vld [vmem:[#allocation6 + $0x910] sm:$0xff]  ;;  %v453_v39 = vld [vmem:[#allocation6 + $0x3e8] sm:$0xff]  ;;  %v449_v43 = vld [vmem:[#allocation6 + $0x3c0] sm:$0xff] }
  0x54   :  { %726 = vmatpush1.msra.mxu0 %v497_v60  ;;  %657 = vmatpush1.msra.mxu1 %v365_v61  ;;  %v454_v37 = vld [vmem:[#allocation6 + $0x3f0] sm:$0xff]  ;;  %v581_v40 = vld [vmem:[#allocation6 + $0x8e8] sm:$0xff]  ;;  %v577_v44 = vld [vmem:[#allocation6 + $0x8c0] sm:$0xff] }
  0x55   :  { %727 = vmatprep.subr.mxu0 %v494_v62  ;;  %658 = vmatprep.subr.mxu1 %v362_v63  ;;  %v582_v38 = vld [vmem:[#allocation6 + $0x8f0] sm:$0xff]  ;;  %v450_v41 = vld [vmem:[#allocation6 + $0x3c8] sm:$0xff]  ;;  %v446_v45 = vld [vmem:[#allocation6 + $0x3a0] sm:$0xff] }
  0x56   :  { %728 = vmatpush1.msra.mxu0 %v493_v1  ;;  %659 = vmatpush1.msra.mxu1 %v361_v2  ;;  %v578_v42 = vld [vmem:[#allocation6 + $0x8c8] sm:$0xff]  ;;  %v574_v46 = vld [vmem:[#allocation6 + $0x8a0] sm:$0xff]  ;;  %v445_v47 = vld [vmem:[#allocation6 + $0x398] sm:$0xff] }
  0x57   :  { %729 = vmatprep.subr.mxu0 %v490_v3  ;;  %660 = vmatprep.subr.mxu1 %v358_v4  ;;  %v573_v48 = vld [vmem:[#allocation6 + $0x898] sm:$0xff]  ;;  %v441_v51 = vld [vmem:[#allocation6 + $0x370] sm:$0xff]  ;;  %v437_v55 = vld [vmem:[#allocation6 + $0x348] sm:$0xff] }
  0x58   :  { %730 = vmatpush1.msra.mxu0 %v489_v5  ;;  %661 = vmatpush1.msra.mxu1 %v357_v6  ;;  %v442_v49 = vld [vmem:[#allocation6 + $0x378] sm:$0xff]  ;;  %v569_v52 = vld [vmem:[#allocation6 + $0x870] sm:$0xff]  ;;  %v565_v56 = vld [vmem:[#allocation6 + $0x848] sm:$0xff] }
  0x59   :  { %731 = vmatprep.subr.mxu0 %v486_v7  ;;  %662 = vmatprep.subr.mxu1 %v354_v8  ;;  %v570_v50 = vld [vmem:[#allocation6 + $0x878] sm:$0xff]  ;;  %v438_v53 = vld [vmem:[#allocation6 + $0x350] sm:$0xff]  ;;  %v434_v57 = vld [vmem:[#allocation6 + $0x328] sm:$0xff] }
  0x5a   :  { %732 = vmatpush1.msra.mxu0 %v485_v9  ;;  %663 = vmatpush1.msra.mxu1 %v353_v10  ;;  %v566_v54 = vld [vmem:[#allocation6 + $0x850] sm:$0xff]  ;;  %v562_v58 = vld [vmem:[#allocation6 + $0x828] sm:$0xff]  ;;  %v433_v59 = vld [vmem:[#allocation6 + $0x320] sm:$0xff] }
  0x5b   :  { %733 = vmatprep.subr.mxu0 %v482_v11  ;;  %664 = vmatprep.subr.mxu1 %v478_v12  ;;  %v561_v60 = vld [vmem:[#allocation6 + $0x820] sm:$0xff]  ;;  %v429_v63 = vld [vmem:[#allocation6 + $0x2f8] sm:$0xff]  ;;  %v425_v4 = vld [vmem:[#allocation6 + $0x2d0] sm:$0xff] }
  0x5c   :  { %734 = vmatpush1.msra.mxu0 %v481_v13  ;;  %665 = vmatpush2.msra.mxu1 %v477_v14  ;;  %v430_v61 = vld [vmem:[#allocation6 + $0x300] sm:$0xff]  ;;  %v557_v1 = vld [vmem:[#allocation6 + $0x7f8] sm:$0xff]  ;;  %v553_v5 = vld [vmem:[#allocation6 + $0x7d0] sm:$0xff] }
  0x5d   :  { %735 = vmatprep.subr.mxu0 %v606_v15  ;;  %666 = vmatprep.subr.mxu1 %v474_v16  ;;  %v558_v62 = vld [vmem:[#allocation6 + $0x800] sm:$0xff]  ;;  %v426_v2 = vld [vmem:[#allocation6 + $0x2d8] sm:$0xff]  ;;  %v422_v6 = vld [vmem:[#allocation6 + $0x2b0] sm:$0xff]  ;;  %v84_v16 = vlaneseq }
  0x5e   :  { %736 = vmatpush2.msra.mxu0 %v605_v17  ;;  %667 = vmatpush2.msra.mxu1 %v473_v18  ;;  %v554_v3 = vld [vmem:[#allocation6 + $0x7d8] sm:$0xff]  ;;  %v550_v7 = vld [vmem:[#allocation6 + $0x7b0] sm:$0xff]  ;;  %v421_v8 = vld [vmem:[#allocation6 + $0x2a8] sm:$0xff] }
  0x5f   :  { %737 = vmatprep.subr.mxu0 %v602_v19  ;;  %668 = vmatprep.subr.mxu1 %v470_v21  ;;  %v549_v9 = vld [vmem:[#allocation6 + $0x7a8] sm:$0xff]  ;;  %v417_v12 = vld [vmem:[#allocation6 + $0x280] sm:$0xff]  ;;  %v416_v14 = vld [vmem:[#allocation6 + $0x270] sm:$0xff]  ;;  %v1727_v17 = vshrl.u32 %v84_v16, 7 }
  0x60   :  { %738 = vmatpush2.msra.mxu0 %v601_v20  ;;  %669 = vmatpush2.msra.mxu1 %v469_v23  ;;  %v418_v10 = vld [vmem:[#allocation6 + $0x288] sm:$0xff]  ;;  %v545_v13 = vld [vmem:[#allocation6 + $0x780] sm:$0xff]  ;;  %v544_v15 = vld [vmem:[#allocation6 + $0x770] sm:$0xff] }
  0x61   :  { %739 = vmatprep.subr.mxu0 %v598_v22  ;;  %670 = vmatprep.subr.mxu1 %v466_v25  ;;  %v546_v11 = vld [vmem:[#allocation6 + $0x788] sm:$0xff]  ;;  %v86_v18 = vsub.s32 0, %v1727_v17  ;;  %v94_v19 = vsub.s32 2, %v1727_v17  ;;  %v90_v21 = vsub.s32 1, %v1727_v17  ;;  %v98_v22 = vsub.s32 3, %v1727_v17 }
  0x62   :  { %740 = vmatpush2.msra.mxu0 %v597_v24  ;;  %671 = vmatpush2.msra.mxu1 %v465_v27  ;;  %v82_v20 = vld [vmem:[#allocation7] ss:$4 sm:$0x1f] }
  0x63   :  { %741 = vmatprep.subr.mxu0 %v594_v26  ;;  %672 = vmatprep.subr.mxu1 %v462_v29  ;;  %v87_v23 = vrot.slane %v82_v20, %v86_v18  ;;  %v95_v24 = vrot.slane %v82_v20, %v94_v19  ;;  %v91_v27 = vrot.slane %v82_v20, %v90_v21  ;;  %v396_v16 = vld [vmem:[#allocation6 + $0x1a8] sm:$0xff] }
  0x64   :  { %742 = vmatpush2.msra.mxu0 %v593_v28  ;;  %673 = vmatpush2.msra.mxu1 %v461_v31  ;;  %v99_v28 = vrot.slane %v82_v20, %v98_v22  ;;  %v524_v20 = vld [vmem:[#allocation6 + $0x6a8] sm:$0xff] }
  0x65   :  { %743 = vmatprep.subr.mxu0 %v590_v30  ;;  %674 = vmatprep.subr.mxu1 %v458_v33 }
  0x66   :  { %744 = vmatpush2.msra.mxu0 %v589_v32  ;;  %675 = vmatpush2.msra.mxu1 %v457_v35 }
  0x67   :  { %745 = vmatprep.subr.mxu0 %v586_v34  ;;  %676 = vmatprep.subr.mxu1 %v454_v37 }
  0x68   :  { %746 = vmatpush2.msra.mxu0 %v585_v36  ;;  %677 = vmatpush2.msra.mxu1 %v453_v39 }
  0x69   :  { %747 = vmatprep.subr.mxu0 %v582_v38  ;;  %678 = vmatprep.subr.mxu1 %v450_v41 }
  0x6a   :  { %748 = vmatpush2.msra.mxu0 %v581_v40  ;;  %679 = vmatpush2.msra.mxu1 %v449_v43 }
  0x6b   :  { %749 = vmatprep.subr.mxu0 %v578_v42  ;;  %680 = vmatprep.subr.mxu1 %v446_v45 }
  0x6c   :  { %750 = vmatpush2.msra.mxu0 %v577_v44  ;;  %681 = vmatpush2.msra.mxu1 %v445_v47 }
  0x6d   :  { %751 = vmatprep.subr.mxu0 %v574_v46  ;;  %682 = vmatprep.subr.mxu1 %v442_v49 }
  0x6e   :  { %752 = vmatpush2.msra.mxu0 %v573_v48  ;;  %683 = vmatpush2.msra.mxu1 %v441_v51 }
  0x6f   :  { %753 = vmatprep.subr.mxu0 %v570_v50  ;;  %684 = vmatprep.subr.mxu1 %v438_v53 }
  0x70   :  { %754 = vmatpush2.msra.mxu0 %v569_v52  ;;  %685 = vmatpush2.msra.mxu1 %v437_v55 }
  0x71   :  { %755 = vmatprep.subr.mxu0 %v566_v54  ;;  %686 = vmatprep.subr.mxu1 %v434_v57 }
  0x72   :  { %756 = vmatpush2.msra.mxu0 %v565_v56  ;;  %687 = vmatpush2.msra.mxu1 %v433_v59 }
  0x73   :  { %757 = vmatprep.subr.mxu0 %v562_v58  ;;  %688 = vmatprep.subr.mxu1 %v430_v61 }
  0x74   :  { %758 = vmatpush2.msra.mxu0 %v561_v60  ;;  %689 = vmatpush2.msra.mxu1 %v429_v63  ;;  %v415_v60 = vld [vmem:[#allocation6 + $0x268] sm:$0xff] }
  0x75   :  { %759 = vmatprep.subr.mxu0 %v558_v62  ;;  %690 = vmatprep.subr.mxu1 %v426_v2  ;;  %v543_v62 = vld [vmem:[#allocation6 + $0x768] sm:$0xff]  ;;  %v411_v2 = vld [vmem:[#allocation6 + $0x240] sm:$0xff] }
  0x76   :  { %760 = vmatpush2.msra.mxu0 %v557_v1  ;;  %691 = vmatpush2.msra.mxu1 %v425_v4  ;;  %v412_v63 = vld [vmem:[#allocation6 + $0x248] sm:$0xff]  ;;  %v408_v4 = vld [vmem:[#allocation6 + $0x220] sm:$0xff] }
  0x77   :  { %761 = vmatprep.subr.mxu0 %v554_v3  ;;  %692 = vmatprep.subr.mxu1 %v422_v6  ;;  %v540_v1 = vld [vmem:[#allocation6 + $0x748] sm:$0xff]  ;;  %v539_v3 = vld [vmem:[#allocation6 + $0x740] sm:$0xff]  ;;  %v407_v6 = vld [vmem:[#allocation6 + $0x218] sm:$0xff] }
  0x78   :  { %762 = vmatpush2.msra.mxu0 %v553_v5  ;;  %693 = vmatpush2.msra.mxu1 %v421_v8  ;;  %v536_v5 = vld [vmem:[#allocation6 + $0x720] sm:$0xff]  ;;  %v404_v8 = vld [vmem:[#allocation6 + $0x1f8] sm:$0xff] }
  0x79   :  { %763 = vmatprep.subr.mxu0 %v550_v7  ;;  %694 = vmatprep.subr.mxu1 %v418_v10  ;;  %v535_v7 = vld [vmem:[#allocation6 + $0x718] sm:$0xff]  ;;  %v403_v10 = vld [vmem:[#allocation6 + $0x1f0] sm:$0xff] }
  0x7a   :  { %764 = vmatpush2.msra.mxu0 %v549_v9  ;;  %695 = vmatpush2.msra.mxu1 %v417_v12  ;;  %v532_v9 = vld [vmem:[#allocation6 + $0x6f8] sm:$0xff]  ;;  %v400_v12 = vld [vmem:[#allocation6 + $0x1d0] sm:$0xff] }
  0x7b   :  { %765 = vmatprep.subr.mxu0 %v546_v11  ;;  %774 = vmatprep.subr.mxu1 %v416_v14  ;;  %v531_v11 = vld [vmem:[#allocation6 + $0x6f0] sm:$0xff]  ;;  %v399_v14 = vld [vmem:[#allocation6 + $0x1c8] sm:$0xff] }
  0x7c   :  { %766 = vmatpush2.msra.mxu0 %v545_v13  ;;  %v528_v13 = vld [vmem:[#allocation6 + $0x6d0] sm:$0xff] }
  0x7d   :  { %845 = vmatprep.subr.mxu0 %v544_v15  ;;  %v527_v15 = vld [vmem:[#allocation6 + $0x6c8] sm:$0xff] }
  0xf8   :  { %v179_v25 = vpop.f32.mrf.mxu0  ;;  %v250_v26 = vpop.f32.mrf.mxu1 }
  0xf9   :  { %v180_v29 = vadd.f32 %v179_v25, %v87_v23  ;;  %v251_v30 = vadd.f32 %v250_v26, %v95_v24  ;;  %v395_v23 = vld [vmem:[#allocation6 + $0x1a0] sm:$0xff] }
  0xfa   :  { %v181_v31 = vpop.f32.mrf.mxu0  ;;  %v252_v32 = vpop.f32.mrf.mxu1  ;;  %v523_v24 = vld [vmem:[#allocation6 + $0x6a0] sm:$0xff] }
  0xfb   :  { %v329_v33 = vmul.f32 1.442695, %v180_v29  ;;  %v333_v34 = vmul.f32 1.442695, %v251_v30  ;;  %v182_v35 = vadd.f32 %v181_v31, %v91_v27  ;;  %v253_v36 = vadd.f32 %v252_v32, %v99_v28  ;;  %v392_v25 = vld [vmem:[#allocation6 + $0x180] sm:$0xff]  ;;  %v391_v27 = vld [vmem:[#allocation6 + $0x178] sm:$0xff] }
  0xfc   :  { %vm325_vm2 = vcmp.gt.f32.partialorder %v180_v29, 0.0  ;;  %vm327_vm3 = vcmp.gt.f32.partialorder %v251_v30, 0.0  ;;  %v520_v26 = vld [vmem:[#allocation6 + $0x680] sm:$0xff]  ;;  %v519_v28 = vld [vmem:[#allocation6 + $0x678] sm:$0xff]  ;;  %v387_v31 = vld [vmem:[#allocation6 + $0x150] sm:$0xff] }
  0xfd   :  { %1561 = vpow2.f32 %v329_v33  ;;  %v1741_v37 = vpop.f32.mrf.mxu0  ;;  %v331_v38 = vmul.f32 1.442695, %v182_v35  ;;  %v335_v39 = vmul.f32 1.442695, %v253_v36  ;;  %vm326_vm4 = vcmp.gt.f32.partialorder %v182_v35, 0.0  ;;  %v515_v32 = vld [vmem:[#allocation6 + $0x650] sm:$0xff] }
  0xfe   :  { %1563 = vpow2.f32 %v333_v34  ;;  %vm328_vm5 = vcmp.gt.f32.partialorder %v253_v36, 0.0  ;;  %v384_v33 = vld [vmem:[#allocation6 + $0x130] sm:$0xff] }
  0xff   :  { %v1482_v40 = vpop.f32.mrf.mxu0  ;;  %1565 = vpow2.f32 %v331_v38  ;;  %v512_v34 = vld [vmem:[#allocation6 + $0x630] sm:$0xff]  ;;  %v380_v38 = vld [vmem:[#allocation6 + $0x108] sm:$0xff] }
 0x100   :  { %1567 = vpow2.f32 %v335_v39  ;;  %v508_v39 = vld [vmem:[#allocation6 + $0x608] sm:$0xff]  ;;  %v379_v40 = vld [vmem:[#allocation6 + $0x100] sm:$0xff] }
 0x10a   :  { %v1562_v41 = vpop.eup %1561 }
 0x10b   :  { %v1564_v42 = vpop.eup %1563  ;;  %v1357_v43 = vadd.f32 -1.0, %v1562_v41  ;;  %v507_v41 = vld [vmem:[#allocation6 + $0x600] sm:$0xff] }
 0x10c   :  { %v1359_v44 = vadd.f32 -1.0, %v1564_v42  ;;  %v1566_v45 = vpop.eup %1565  ;;  %v376_v42 = vld [vmem:[#allocation6 + $0xe0] sm:$0xff] }
 0x10d   :  { %v341_v46 = vmul.f32 1.6732632, %v1357_v43  ;;  %v1568_v47 = vpop.eup %1567  ;;  %v1358_v49 = vadd.f32 -1.0, %v1566_v45  ;;  %v504_v43 = vld [vmem:[#allocation6 + $0x5e0] sm:$0xff]  ;;  %v503_v45 = vld [vmem:[#allocation6 + $0x5d8] sm:$0xff] }
 0x10e   :  { %v343_v48 = vmul.f32 1.6732632, %v1359_v44  ;;  %v1360_v50 = vadd.f32 -1.0, %v1568_v47  ;;  %v375_v44 = vld [vmem:[#allocation6 + $0xd8] sm:$0xff] }
 0x10f   :  { %v342_v51 = vmul.f32 1.6732632, %v1358_v49  ;;  %v345_v52 = vsel %vm325_vm2, %v180_v29, %v341_v46  ;;  %v388_v29 = vld [vmem:[#allocation6 + $0x158] sm:$0xff]  ;;  %v499_v49 = vld [vmem:[#allocation6 + $0x5b0] sm:$0xff] }
 0x110   :  { %v344_v53 = vmul.f32 1.6732632, %v1360_v50  ;;  %v347_v54 = vsel %vm327_vm3, %v251_v30, %v343_v48  ;;  %v1743_v58 = vmul.f32 1.050701, %v345_v52  ;;  %v516_v30 = vld [vmem:[#allocation6 + $0x658] sm:$0xff]  ;;  %v371_v48 = vld [vmem:[#allocation6 + $0xb0] sm:$0xff] }
 0x111   :  { %v346_v55 = vsel %vm326_vm4, %v182_v35, %v342_v51  ;;  %v1745_v61 = vmul.f32 1.050701, %v347_v54  ;;  %v383_v35 = vld [vmem:[#allocation6 + $0x128] sm:$0xff]  ;;  %v372_v46 = vld [vmem:[#allocation6 + $0xb8] sm:$0xff]  ;;  %v368_v50 = vld [vmem:[#allocation6 + $0x90] sm:$0xff] }
 0x112   :  { %v350_v56 = vmul.f32 1.050701, %v346_v55  ;;  %v348_v57 = vsel %vm328_vm5, %v253_v36, %v344_v53  ;;  %v511_v36 = vld [vmem:[#allocation6 + $0x628] sm:$0xff]  ;;  %v500_v47 = vld [vmem:[#allocation6 + $0x5b8] sm:$0xff]  ;;  %v496_v51 = vld [vmem:[#allocation6 + $0x590] sm:$0xff] }
 0x113   :  { %v352_v59 = vmul.f32 1.050701, %v348_v57  ;;  %v367_v52 = vld [vmem:[#allocation6 + $0x88] sm:$0xff]  ;;  %v491_v57 = vld [vmem:[#allocation6 + $0x560] sm:$0xff] }
 0x114   :  { %696 = vmatprep.mubr.f32.mxu1 %v350_v56  ;;  %v495_v53 = vld [vmem:[#allocation6 + $0x588] sm:$0xff] }
 0x115   :  { %767 = vmatprep.mubr.f32.mxu0 %v352_v59  ;;  %697 = vmatmul.mubr.f32.vlgmr.msra.gmra.mxu1 %v1743_v58  ;;  %v364_v54 = vld [vmem:[#allocation6 + $0x68] sm:$0xff] }
 0x116   :  { %768 = vmatmul.mubr.f32.vlgmr.msra.gmra.mxu0 %v1745_v61  ;;  %775 = vmatpush1.msra.mxu1 %v415_v60  ;;  %v492_v55 = vld [vmem:[#allocation6 + $0x568] sm:$0xff]  ;;  %v488_v60 = vld [vmem:[#allocation6 + $0x540] sm:$0xff] }
 0x117   :  { %846 = vmatpush1.msra.mxu0 %v543_v62  ;;  %776 = vmatprep.subr.mxu1 %v412_v63  ;;  %v359_v62 = vld [vmem:[#allocation6 + $0x38] sm:$0xff] }
 0x118   :  { %838 = vmatprep.mubr.f32.mxu1 %v350_v56  ;;  %847 = vmatprep.subr.mxu0 %v540_v1  ;;  %v363_v56 = vld [vmem:[#allocation6 + $0x60] sm:$0xff]  ;;  %v487_v63 = vld [vmem:[#allocation6 + $0x538] sm:$0xff] }
 0x119   :  { %909 = vmatprep.mubr.f32.mxu0 %v352_v59  ;;  %777 = vmatpush1.msra.mxu1 %v411_v2  ;;  %v360_v59 = vld [vmem:[#allocation6 + $0x40] sm:$0xff]  ;;  %v356_v1 = vld [vmem:[#allocation6 + $0x18] sm:$0xff] }
 0x11a   :  { %848 = vmatpush1.msra.mxu0 %v539_v3  ;;  %778 = vmatprep.subr.mxu1 %v408_v4  ;;  %v484_v2 = vld [vmem:[#allocation6 + $0x518] sm:$0xff]  ;;  %v355_v3 = vld [vmem:[#allocation6 + $0x10] sm:$0xff] }
 0x11b   :  { %849 = vmatprep.subr.mxu0 %v536_v5  ;;  %779 = vmatpush1.msra.mxu1 %v407_v6  ;;  %v483_v4 = vld [vmem:[#allocation6 + $0x510] sm:$0xff] }
 0x11c   :  { %850 = vmatpush1.msra.mxu0 %v535_v7  ;;  %780 = vmatprep.subr.mxu1 %v404_v8  ;;  %v480_v5 = vld [vmem:[#allocation6 + $0x4f0] sm:$0xff]  ;;  %v479_v7 = vld [vmem:[#allocation6 + $0x4e8] sm:$0xff] }
 0x11d   :  { %851 = vmatprep.subr.mxu0 %v532_v9  ;;  %781 = vmatpush1.msra.mxu1 %v403_v10  ;;  %v608_v6 = vld [vmem:[#allocation6 + $0x9f0] sm:$0xff]  ;;  %v607_v8 = vld [vmem:[#allocation6 + $0x9e8] sm:$0xff] }
 0x11e   :  { %852 = vmatpush1.msra.mxu0 %v531_v11  ;;  %782 = vmatprep.subr.mxu1 %v400_v12  ;;  %v476_v9 = vld [vmem:[#allocation6 + $0x4c8] sm:$0xff]  ;;  %v475_v11 = vld [vmem:[#allocation6 + $0x4c0] sm:$0xff] }
 0x11f   :  { %853 = vmatprep.subr.mxu0 %v528_v13  ;;  %783 = vmatpush1.msra.mxu1 %v399_v14  ;;  %v604_v10 = vld [vmem:[#allocation6 + $0x9c8] sm:$0xff]  ;;  %v603_v12 = vld [vmem:[#allocation6 + $0x9c0] sm:$0xff] }
 0x120   :  { %854 = vmatpush1.msra.mxu0 %v527_v15  ;;  %784 = vmatprep.subr.mxu1 %v396_v16  ;;  %v472_v13 = vld [vmem:[#allocation6 + $0x4a0] sm:$0xff]  ;;  %v471_v15 = vld [vmem:[#allocation6 + $0x498] sm:$0xff] }
 0x121   :  { %855 = vmatprep.subr.mxu0 %v524_v20  ;;  %785 = vmatpush1.msra.mxu1 %v395_v23  ;;  %v600_v14 = vld [vmem:[#allocation6 + $0x9a0] sm:$0xff]  ;;  %v599_v16 = vld [vmem:[#allocation6 + $0x998] sm:$0xff] }
 0x122   :  { %856 = vmatpush1.msra.mxu0 %v523_v24  ;;  %786 = vmatprep.subr.mxu1 %v392_v25  ;;  %v468_v20 = vld [vmem:[#allocation6 + $0x478] sm:$0xff]  ;;  %v467_v24 = vld [vmem:[#allocation6 + $0x470] sm:$0xff] }
 0x123   :  { %857 = vmatprep.subr.mxu0 %v520_v26  ;;  %787 = vmatpush1.msra.mxu1 %v391_v27  ;;  %v596_v23 = vld [vmem:[#allocation6 + $0x978] sm:$0xff]  ;;  %v595_v25 = vld [vmem:[#allocation6 + $0x970] sm:$0xff] }
 0x124   :  { %858 = vmatpush1.msra.mxu0 %v519_v28  ;;  %788 = vmatprep.subr.mxu1 %v388_v29  ;;  %v464_v26 = vld [vmem:[#allocation6 + $0x450] sm:$0xff]  ;;  %v463_v28 = vld [vmem:[#allocation6 + $0x448] sm:$0xff] }
 0x125   :  { %859 = vmatprep.subr.mxu0 %v516_v30  ;;  %789 = vmatpush1.msra.mxu1 %v387_v31  ;;  %v592_v27 = vld [vmem:[#allocation6 + $0x950] sm:$0xff]  ;;  %v591_v29 = vld [vmem:[#allocation6 + $0x948] sm:$0xff] }
 0x126   :  { %860 = vmatpush1.msra.mxu0 %v515_v32  ;;  %790 = vmatprep.subr.mxu1 %v384_v33  ;;  %v460_v30 = vld [vmem:[#allocation6 + $0x428] sm:$0xff]  ;;  %v459_v32 = vld [vmem:[#allocation6 + $0x420] sm:$0xff] }
 0x127   :  { %861 = vmatprep.subr.mxu0 %v512_v34  ;;  %791 = vmatpush1.msra.mxu1 %v383_v35  ;;  %v588_v31 = vld [vmem:[#allocation6 + $0x928] sm:$0xff]  ;;  %v587_v33 = vld [vmem:[#allocation6 + $0x920] sm:$0xff] }
 0x128   :  { %862 = vmatpush1.msra.mxu0 %v511_v36  ;;  %792 = vmatprep.subr.mxu1 %v380_v38  ;;  %v456_v34 = vld [vmem:[#allocation6 + $0x400] sm:$0xff]  ;;  %v455_v36 = vld [vmem:[#allocation6 + $0x3f8] sm:$0xff] }
 0x129   :  { %863 = vmatprep.subr.mxu0 %v508_v39  ;;  %793 = vmatpush1.msra.mxu1 %v379_v40  ;;  %v584_v35 = vld [vmem:[#allocation6 + $0x900] sm:$0xff]  ;;  %v583_v38 = vld [vmem:[#allocation6 + $0x8f8] sm:$0xff] }
 0x12a   :  { %864 = vmatpush1.msra.mxu0 %v507_v41  ;;  %794 = vmatprep.subr.mxu1 %v376_v42  ;;  %v452_v39 = vld [vmem:[#allocation6 + $0x3d8] sm:$0xff]  ;;  %v451_v41 = vld [vmem:[#allocation6 + $0x3d0] sm:$0xff] }
 0x12b   :  { %865 = vmatprep.subr.mxu0 %v504_v43  ;;  %795 = vmatpush1.msra.mxu1 %v375_v44  ;;  %v580_v40 = vld [vmem:[#allocation6 + $0x8d8] sm:$0xff]  ;;  %v579_v42 = vld [vmem:[#allocation6 + $0x8d0] sm:$0xff] }
 0x12c   :  { %866 = vmatpush1.msra.mxu0 %v503_v45  ;;  %796 = vmatprep.subr.mxu1 %v372_v46  ;;  %v448_v43 = vld [vmem:[#allocation6 + $0x3b0] sm:$0xff]  ;;  %v447_v45 = vld [vmem:[#allocation6 + $0x3a8] sm:$0xff] }
 0x12d   :  { %867 = vmatprep.subr.mxu0 %v500_v47  ;;  %797 = vmatpush1.msra.mxu1 %v371_v48  ;;  %v576_v44 = vld [vmem:[#allocation6 + $0x8b0] sm:$0xff]  ;;  %v575_v46 = vld [vmem:[#allocation6 + $0x8a8] sm:$0xff] }
 0x12e   :  { %868 = vmatpush1.msra.mxu0 %v499_v49  ;;  %798 = vmatprep.subr.mxu1 %v368_v50  ;;  %v444_v47 = vld [vmem:[#allocation6 + $0x388] sm:$0xff]  ;;  %v443_v49 = vld [vmem:[#allocation6 + $0x380] sm:$0xff] }
 0x12f   :  { %869 = vmatprep.subr.mxu0 %v496_v51  ;;  %799 = vmatpush1.msra.mxu1 %v367_v52  ;;  %v572_v48 = vld [vmem:[#allocation6 + $0x888] sm:$0xff]  ;;  %v571_v50 = vld [vmem:[#allocation6 + $0x880] sm:$0xff] }
 0x130   :  { %870 = vmatpush1.msra.mxu0 %v495_v53  ;;  %800 = vmatprep.subr.mxu1 %v364_v54  ;;  %v440_v51 = vld [vmem:[#allocation6 + $0x360] sm:$0xff]  ;;  %v439_v53 = vld [vmem:[#allocation6 + $0x358] sm:$0xff] }
 0x131   :  { %871 = vmatprep.subr.mxu0 %v492_v55  ;;  %801 = vmatpush1.msra.mxu1 %v363_v56  ;;  %v568_v52 = vld [vmem:[#allocation6 + $0x860] sm:$0xff]  ;;  %v567_v54 = vld [vmem:[#allocation6 + $0x858] sm:$0xff] }
 0x132   :  { %872 = vmatpush1.msra.mxu0 %v491_v57  ;;  %802 = vmatprep.subr.mxu1 %v360_v59  ;;  %v436_v55 = vld [vmem:[#allocation6 + $0x338] sm:$0xff]  ;;  %v435_v57 = vld [vmem:[#allocation6 + $0x330] sm:$0xff] }
 0x133   :  { %873 = vmatprep.subr.mxu0 %v488_v60  ;;  %803 = vmatpush1.msra.mxu1 %v359_v62  ;;  %v564_v56 = vld [vmem:[#allocation6 + $0x838] sm:$0xff]  ;;  %v563_v59 = vld [vmem:[#allocation6 + $0x830] sm:$0xff] }
 0x134   :  { %874 = vmatpush1.msra.mxu0 %v487_v63  ;;  %804 = vmatprep.subr.mxu1 %v356_v1  ;;  %v432_v60 = vld [vmem:[#allocation6 + $0x310] sm:$0xff]  ;;  %v431_v63 = vld [vmem:[#allocation6 + $0x308] sm:$0xff] }
 0x135   :  { %875 = vmatprep.subr.mxu0 %v484_v2  ;;  %805 = vmatpush1.msra.mxu1 %v355_v3  ;;  %v560_v62 = vld [vmem:[#allocation6 + $0x810] sm:$0xff]  ;;  %v559_v1 = vld [vmem:[#allocation6 + $0x808] sm:$0xff] }
 0x136   :  { %876 = vmatpush1.msra.mxu0 %v483_v4  ;;  %806 = vmatprep.subr.mxu1 %v480_v5  ;;  %v428_v2 = vld [vmem:[#allocation6 + $0x2e8] sm:$0xff]  ;;  %v427_v4 = vld [vmem:[#allocation6 + $0x2e0] sm:$0xff] }
 0x137   :  { %877 = vmatprep.subr.mxu0 %v608_v6  ;;  %807 = vmatpush2.msra.mxu1 %v479_v7  ;;  %v556_v3 = vld [vmem:[#allocation6 + $0x7e8] sm:$0xff]  ;;  %v555_v5 = vld [vmem:[#allocation6 + $0x7e0] sm:$0xff] }
 0x138   :  { %878 = vmatpush2.msra.mxu0 %v607_v8  ;;  %808 = vmatprep.subr.mxu1 %v476_v9  ;;  %v424_v6 = vld [vmem:[#allocation6 + $0x2c0] sm:$0xff]  ;;  %v423_v8 = vld [vmem:[#allocation6 + $0x2b8] sm:$0xff] }
 0x139   :  { %879 = vmatprep.subr.mxu0 %v604_v10  ;;  %809 = vmatpush2.msra.mxu1 %v475_v11  ;;  %v552_v7 = vld [vmem:[#allocation6 + $0x7c0] sm:$0xff]  ;;  %v551_v9 = vld [vmem:[#allocation6 + $0x7b8] sm:$0xff] }
 0x13a   :  { %880 = vmatpush2.msra.mxu0 %v603_v12  ;;  %810 = vmatprep.subr.mxu1 %v472_v13  ;;  %v420_v10 = vld [vmem:[#allocation6 + $0x298] sm:$0xff]  ;;  %v419_v12 = vld [vmem:[#allocation6 + $0x290] sm:$0xff] }
 0x13b   :  { %881 = vmatprep.subr.mxu0 %v600_v14  ;;  %811 = vmatpush2.msra.mxu1 %v471_v15  ;;  %v548_v11 = vld [vmem:[#allocation6 + $0x798] sm:$0xff]  ;;  %v547_v13 = vld [vmem:[#allocation6 + $0x790] sm:$0xff] }
 0x13c   :  { %882 = vmatpush2.msra.mxu0 %v599_v16  ;;  %812 = vmatprep.subr.mxu1 %v468_v20  ;;  %v975_v14 = vld [vmem:[#allocation6 + $0x4f8] sm:$0xff]  ;;  %v974_v16 = vld [vmem:[#allocation6 + $0x4d0] sm:$0xff] }
 0x13d   :  { %883 = vmatprep.subr.mxu0 %v596_v23  ;;  %813 = vmatpush2.msra.mxu1 %v467_v24  ;;  %v959_v15 = vld [vmem:[#allocation6 + $0x278] sm:$0xff]  ;;  %v958_v20 = vld [vmem:[#allocation6 + $0x250] sm:$0xff]  ;;  %v973_v23 = vld [vmem:[#allocation6 + $0x4a8] sm:$0xff] }
 0x13e   :  { %884 = vmatpush2.msra.mxu0 %v595_v25  ;;  %814 = vmatprep.subr.mxu1 %v464_v26  ;;  %v957_v24 = vld [vmem:[#allocation6 + $0x228] sm:$0xff]  ;;  %v972_v25 = vld [vmem:[#allocation6 + $0x480] sm:$0xff] }
 0x13f   :  { %885 = vmatprep.subr.mxu0 %v592_v27  ;;  %815 = vmatpush2.msra.mxu1 %v463_v28  ;;  %v956_v26 = vld [vmem:[#allocation6 + $0x200] sm:$0xff]  ;;  %v971_v27 = vld [vmem:[#allocation6 + $0x458] sm:$0xff]  ;;  %v954_v28 = vld [vmem:[#allocation6 + $0x1b0] sm:$0xff] }
 0x140   :  { %886 = vmatpush2.msra.mxu0 %v591_v29  ;;  %816 = vmatprep.subr.mxu1 %v460_v30  ;;  %v969_v29 = vld [vmem:[#allocation6 + $0x408] sm:$0xff] }
 0x141   :  { %887 = vmatprep.subr.mxu0 %v588_v31  ;;  %817 = vmatpush2.msra.mxu1 %v459_v32  ;;  %v953_v30 = vld [vmem:[#allocation6 + $0x188] sm:$0xff]  ;;  %v968_v31 = vld [vmem:[#allocation6 + $0x3e0] sm:$0xff] }
 0x142   :  { %888 = vmatpush2.msra.mxu0 %v587_v33  ;;  %818 = vmatprep.subr.mxu1 %v456_v34  ;;  %v952_v32 = vld [vmem:[#allocation6 + $0x160] sm:$0xff]  ;;  %v967_v33 = vld [vmem:[#allocation6 + $0x3b8] sm:$0xff] }
 0x143   :  { %889 = vmatprep.subr.mxu0 %v584_v35  ;;  %819 = vmatpush2.msra.mxu1 %v455_v36  ;;  %v951_v34 = vld [vmem:[#allocation6 + $0x138] sm:$0xff]  ;;  %v966_v35 = vld [vmem:[#allocation6 + $0x390] sm:$0xff] }
 0x144   :  { %890 = vmatpush2.msra.mxu0 %v583_v38  ;;  %820 = vmatprep.subr.mxu1 %v452_v39  ;;  %v950_v36 = vld [vmem:[#allocation6 + $0x110] sm:$0xff]  ;;  %v965_v38 = vld [vmem:[#allocation6 + $0x368] sm:$0xff] }
 0x145   :  { %891 = vmatprep.subr.mxu0 %v580_v40  ;;  %821 = vmatpush2.msra.mxu1 %v451_v41  ;;  %v949_v39 = vld [vmem:[#allocation6 + $0xe8] sm:$0xff]  ;;  %v964_v40 = vld [vmem:[#allocation6 + $0x340] sm:$0xff] }
 0x146   :  { %892 = vmatpush2.msra.mxu0 %v579_v42  ;;  %822 = vmatprep.subr.mxu1 %v448_v43  ;;  %v948_v41 = vld [vmem:[#allocation6 + $0xc0] sm:$0xff]  ;;  %v963_v42 = vld [vmem:[#allocation6 + $0x318] sm:$0xff] }
 0x147   :  { %893 = vmatprep.subr.mxu0 %v576_v44  ;;  %823 = vmatpush2.msra.mxu1 %v447_v45  ;;  %v947_v43 = vld [vmem:[#allocation6 + $0x98] sm:$0xff]  ;;  %v962_v44 = vld [vmem:[#allocation6 + $0x2f0] sm:$0xff] }
 0x148   :  { %894 = vmatpush2.msra.mxu0 %v575_v46  ;;  %824 = vmatprep.subr.mxu1 %v444_v47  ;;  %v946_v45 = vld [vmem:[#allocation6 + $0x70] sm:$0xff]  ;;  %v961_v46 = vld [vmem:[#allocation6 + $0x2c8] sm:$0xff] }
 0x149   :  { %895 = vmatprep.subr.mxu0 %v572_v48  ;;  %825 = vmatpush2.msra.mxu1 %v443_v49  ;;  %v945_v47 = vld [vmem:[#allocation6 + $0x48] sm:$0xff]  ;;  %v960_v48 = vld [vmem:[#allocation6 + $0x2a0] sm:$0xff] }
 0x14a   :  { %896 = vmatpush2.msra.mxu0 %v571_v50  ;;  %826 = vmatprep.subr.mxu1 %v440_v51  ;;  %v944_v49 = vld [vmem:[#allocation6 + $0x20] sm:$0xff]  ;;  %v1007_v50 = vld [vmem:[#allocation6 + $0x9f8] sm:$0xff] }
 0x14b   :  { %897 = vmatprep.subr.mxu0 %v568_v52  ;;  %827 = vmatpush2.msra.mxu1 %v439_v53  ;;  %v991_v51 = vld [vmem:[#allocation6 + $0x778] sm:$0xff]  ;;  %v1006_v52 = vld [vmem:[#allocation6 + $0x9d0] sm:$0xff] }
 0x14c   :  { %898 = vmatpush2.msra.mxu0 %v567_v54  ;;  %828 = vmatprep.subr.mxu1 %v436_v55  ;;  %v990_v53 = vld [vmem:[#allocation6 + $0x750] sm:$0xff]  ;;  %v1005_v54 = vld [vmem:[#allocation6 + $0x9a8] sm:$0xff] }
 0x14d   :  { %899 = vmatprep.subr.mxu0 %v564_v56  ;;  %829 = vmatpush2.msra.mxu1 %v435_v57  ;;  %v989_v55 = vld [vmem:[#allocation6 + $0x728] sm:$0xff]  ;;  %v1004_v56 = vld [vmem:[#allocation6 + $0x980] sm:$0xff] }
 0x14e   :  { %900 = vmatpush2.msra.mxu0 %v563_v59  ;;  %830 = vmatprep.subr.mxu1 %v432_v60  ;;  %v988_v57 = vld [vmem:[#allocation6 + $0x700] sm:$0xff]  ;;  %v1003_v59 = vld [vmem:[#allocation6 + $0x958] sm:$0xff] }
 0x14f   :  { %901 = vmatprep.subr.mxu0 %v560_v62  ;;  %831 = vmatpush2.msra.mxu1 %v431_v63  ;;  %v987_v60 = vld [vmem:[#allocation6 + $0x6d8] sm:$0xff]  ;;  %v1002_v62 = vld [vmem:[#allocation6 + $0x930] sm:$0xff] }
 0x150   :  { %902 = vmatpush2.msra.mxu0 %v559_v1  ;;  %832 = vmatprep.subr.mxu1 %v428_v2  ;;  %v986_v63 = vld [vmem:[#allocation6 + $0x6b0] sm:$0xff]  ;;  %v1001_v1 = vld [vmem:[#allocation6 + $0x908] sm:$0xff] }
 0x151   :  { %903 = vmatprep.subr.mxu0 %v556_v3  ;;  %833 = vmatpush2.msra.mxu1 %v427_v4  ;;  %v985_v2 = vld [vmem:[#allocation6 + $0x688] sm:$0xff]  ;;  %v1000_v3 = vld [vmem:[#allocation6 + $0x8e0] sm:$0xff] }
 0x152   :  { %904 = vmatpush2.msra.mxu0 %v555_v5  ;;  %834 = vmatprep.subr.mxu1 %v424_v6  ;;  %v984_v4 = vld [vmem:[#allocation6 + $0x660] sm:$0xff]  ;;  %v999_v5 = vld [vmem:[#allocation6 + $0x8b8] sm:$0xff] }
 0x153   :  { %905 = vmatprep.subr.mxu0 %v552_v7  ;;  %835 = vmatpush2.msra.mxu1 %v423_v8  ;;  %v983_v6 = vld [vmem:[#allocation6 + $0x638] sm:$0xff]  ;;  %v998_v7 = vld [vmem:[#allocation6 + $0x890] sm:$0xff] }
 0x154   :  { %906 = vmatpush2.msra.mxu0 %v551_v9  ;;  %836 = vmatprep.subr.mxu1 %v420_v10  ;;  %v982_v8 = vld [vmem:[#allocation6 + $0x610] sm:$0xff]  ;;  %v997_v9 = vld [vmem:[#allocation6 + $0x868] sm:$0xff] }
 0x155   :  { %907 = vmatprep.subr.mxu0 %v548_v11  ;;  %837 = vmatpush2.msra.mxu1 %v419_v12  ;;  %v981_v10 = vld [vmem:[#allocation6 + $0x5e8] sm:$0xff]  ;;  %v996_v11 = vld [vmem:[#allocation6 + $0x840] sm:$0xff] }
 0x156   :  { %908 = vmatpush2.msra.mxu0 %v547_v13  ;;  %839 = vmatmul.mubr.f32.vlgmr.msra.gmra.mxu1 %v1743_v58  ;;  %v955_v58 = vld [vmem:[#allocation6 + $0x1d8] sm:$0xff]  ;;  %v980_v12 = vld [vmem:[#allocation6 + $0x5c0] sm:$0xff] }
 0x157   :  { %910 = vmatmul.mubr.f32.vlgmr.msra.gmra.mxu0 %v1745_v61  ;;  %1372 = vmatprep.subr.mxu1 %v975_v14  ;;  %v970_v61 = vld [vmem:[#allocation6 + $0x430] sm:$0xff]  ;;  %v995_v13 = vld [vmem:[#allocation6 + $0x818] sm:$0xff] }
 0x158   :  { %1373 = vmatpush3.msra.mxu1 %v959_v15  ;;  %1407 = vmatprep.subr.mxu0 %v1007_v50  ;;  %v979_v14 = vld [vmem:[#allocation6 + $0x598] sm:$0xff]  ;;  %v994_v15 = vld [vmem:[#allocation6 + $0x7f0] sm:$0xff] }
 0x159   :  { %1374 = vmatprep.subr.mxu1 %v974_v16  ;;  %1408 = vmatpush3.msra.mxu0 %v991_v51  ;;  %v978_v16 = vld [vmem:[#allocation6 + $0x570] sm:$0xff] }
 0x15a   :  { %1375 = vmatpush3.msra.mxu1 %v958_v20  ;;  %1409 = vmatprep.subr.mxu0 %v1006_v52  ;;  %v993_v20 = vld [vmem:[#allocation6 + $0x7c8] sm:$0xff] }
 0x15b   :  { %1376 = vmatprep.subr.mxu1 %v973_v23  ;;  %1410 = vmatpush3.msra.mxu0 %v990_v53  ;;  %v977_v23 = vld [vmem:[#allocation6 + $0x548] sm:$0xff] }
 0x15c   :  { %1377 = vmatpush3.msra.mxu1 %v957_v24  ;;  %1411 = vmatprep.subr.mxu0 %v1005_v54  ;;  %v992_v24 = vld [vmem:[#allocation6 + $0x7a0] sm:$0xff] }
 0x15d   :  { %1378 = vmatprep.subr.mxu1 %v972_v25  ;;  %1412 = vmatpush3.msra.mxu0 %v989_v55  ;;  %v976_v25 = vld [vmem:[#allocation6 + $0x520] sm:$0xff] }
 0x15e   :  { %1379 = vmatpush3.msra.mxu1 %v956_v26  ;;  %1413 = vmatprep.subr.mxu0 %v1004_v56  ;;  %v610_v26 = vld [vmem:[#allocation7 + $0x1] ss:$4 sm:$0xf] }
 0x15f   :  { %1380 = vmatprep.subr.mxu1 %v971_v27  ;;  %1414 = vmatpush3.msra.mxu0 %v988_v57  ;;  %v615_v27 = vrot.slane %v610_v26, %v86_v18 }
 0x160   :  { %1381 = vmatpush3.msra.mxu1 %v955_v58  ;;  %1415 = vmatprep.subr.mxu0 %v1003_v59  ;;  %v619_v58 = vrot.slane %v610_v26, %v90_v21 }
 0x161   :  { %1382 = vmatprep.subr.mxu1 %v970_v61  ;;  %1416 = vmatpush3.msra.mxu0 %v987_v60 }
 0x162   :  { %1383 = vmatpush3.msra.mxu1 %v954_v28  ;;  %1417 = vmatprep.subr.mxu0 %v1002_v62 }
 0x163   :  { %1384 = vmatprep.subr.mxu1 %v969_v29  ;;  %1418 = vmatpush3.msra.mxu0 %v986_v63 }
 0x164   :  { %1385 = vmatpush3.msra.mxu1 %v953_v30  ;;  %1419 = vmatprep.subr.mxu0 %v1001_v1 }
 0x165   :  { %1386 = vmatprep.subr.mxu1 %v968_v31  ;;  %1420 = vmatpush3.msra.mxu0 %v985_v2 }
 0x166   :  { %1387 = vmatpush3.msra.mxu1 %v952_v32  ;;  %1421 = vmatprep.subr.mxu0 %v1000_v3 }
 0x167   :  { %1388 = vmatprep.subr.mxu1 %v967_v33  ;;  %1422 = vmatpush3.msra.mxu0 %v984_v4 }
 0x168   :  { %1389 = vmatpush3.msra.mxu1 %v951_v34  ;;  %1423 = vmatprep.subr.mxu0 %v999_v5  ;;  %v1171_v5 = vld [vmem:[%s1899_s3 + $0xf0] sm:$0xff] }
 0x169   :  { %1390 = vmatprep.subr.mxu1 %v966_v35  ;;  %1424 = vmatpush3.msra.mxu0 %v983_v6  ;;  %v1170_v6 = vld [vmem:[%s1899_s3 + $0xe0] sm:$0xff] }
 0x16a   :  { %1391 = vmatpush3.msra.mxu1 %v950_v36  ;;  %1425 = vmatprep.subr.mxu0 %v998_v7  ;;  %v1169_v7 = vld [vmem:[%s1899_s3 + $0xd0] sm:$0xff] }
 0x16b   :  { %1392 = vmatprep.subr.mxu1 %v965_v38  ;;  %1426 = vmatpush3.msra.mxu0 %v982_v8  ;;  %v1168_v8 = vld [vmem:[%s1899_s3 + $0xc0] sm:$0xff] }
 0x16c   :  { %1393 = vmatpush3.msra.mxu1 %v949_v39  ;;  %1427 = vmatprep.subr.mxu0 %v997_v9  ;;  %v1167_v9 = vld [vmem:[%s1899_s3 + $0xb0] sm:$0xff] }
 0x16d   :  { %1394 = vmatprep.subr.mxu1 %v964_v40  ;;  %1428 = vmatpush3.msra.mxu0 %v981_v10  ;;  %v1166_v10 = vld [vmem:[%s1899_s3 + $0xa0] sm:$0xff] }
 0x16e   :  { %1395 = vmatpush3.msra.mxu1 %v948_v41  ;;  %1429 = vmatprep.subr.mxu0 %v996_v11  ;;  %v1165_v11 = vld [vmem:[%s1899_s3 + $0x90] sm:$0xff] }
 0x16f   :  { %1396 = vmatprep.subr.mxu1 %v963_v42  ;;  %1430 = vmatpush3.msra.mxu0 %v980_v12  ;;  %v1164_v12 = vld [vmem:[%s1899_s3 + $0x80] sm:$0xff] }
 0x170   :  { %1397 = vmatpush3.msra.mxu1 %v947_v43  ;;  %1431 = vmatprep.subr.mxu0 %v995_v13  ;;  %v1163_v13 = vld [vmem:[%s1899_s3 + $0x70] sm:$0xff] }
 0x171   :  { %1398 = vmatprep.subr.mxu1 %v962_v44  ;;  %1432 = vmatpush3.msra.mxu0 %v979_v14  ;;  %v1162_v14 = vld [vmem:[%s1899_s3 + $0x60] sm:$0xff] }
 0x172   :  { %1399 = vmatpush3.msra.mxu1 %v946_v45  ;;  %1433 = vmatprep.subr.mxu0 %v994_v15  ;;  %v1161_v15 = vld [vmem:[%s1899_s3 + $0x50] sm:$0xff] }
 0x173   :  { %1400 = vmatprep.subr.mxu1 %v961_v46  ;;  %1434 = vmatpush3.msra.mxu0 %v978_v16  ;;  %v623_v46 = vrot.slane %v610_v26, %v94_v19  ;;  %v1160_v16 = vld [vmem:[%s1899_s3 + $0x40] sm:$0xff] }
 0x174   :  { %1401 = vmatpush3.msra.mxu1 %v945_v47  ;;  %1435 = vmatprep.subr.mxu0 %v993_v20  ;;  %v627_v47 = vrot.slane %v610_v26, %v98_v22  ;;  %v1159_v20 = vld [vmem:[%s1899_s3 + $0x30] sm:$0xff]  ;;  %v1269_v26 = vld [vmem:[%s1899_s3 + $0xf8] sm:$0xff] }
 0x175   :  { %1402 = vmatprep.subr.mxu1 %v960_v48  ;;  %1436 = vmatpush3.msra.mxu0 %v977_v23  ;;  %v1158_v23 = vld [vmem:[%s1899_s3 + $0x20] sm:$0xff] }
 0x176   :  { %1403 = vmatpush3.msra.mxu1 %v944_v49  ;;  %1437 = vmatprep.subr.mxu0 %v992_v24  ;;  %v1157_v24 = vld [vmem:[%s1899_s3 + $0x10] sm:$0xff] }
 0x177   :  { %1483 = vmatprep.subr.mxu1 %v1674_v0  ;;  %1438 = vmatpush3.msra.mxu0 %v976_v25  ;;  %v1156_v25 = vld [vmem:[%s1899_s3] sm:$0xff] }
 0x178   :  { %1518 = vmatprep.subr.mxu0 %v1674_v0 }
 0x1d5   :  { %v698_v61 = vpop.f32.mrf.mxu1 }
 0x1d6   :  { %v699_v28 = vadd.f32 %v698_v61, %v615_v27  ;;  %v769_v29 = vpop.f32.mrf.mxu0  ;;  %v1268_v27 = vld [vmem:[%s1899_s3 + $0xe8] sm:$0xff] }
 0x1d7   :  { %v700_v30 = vpop.f32.mrf.mxu1 }
 0x1d8   :  { %v770_v31 = vadd.f32 %v769_v29, %v699_v28  ;;  %v701_v32 = vadd.f32 %v700_v30, %v619_v58  ;;  %v771_v33 = vpop.f32.mrf.mxu0  ;;  %v1267_v58 = vld [vmem:[%s1899_s3 + $0xd8] sm:$0xff]  ;;  %v102_v28 = vsub.s32 4, %v1727_v17  ;;  %v1266_v17 = vld [vmem:[%s1899_s3 + $0xc8] sm:$0xff] }
 0x1da   :  { %v920_v34 = vmul.f32 1.442695, %v770_v31  ;;  %v772_v35 = vadd.f32 %v771_v33, %v701_v32  ;;  %vm916_vm6 = vcmp.gt.f32.partialorder %v770_v31, 0.0 }
 0x1dc   :  { %1569 = vpow2.f32 %v920_v34  ;;  %v922_v36 = vmul.f32 1.442695, %v772_v35  ;;  %vm917_vm7 = vcmp.gt.f32.partialorder %v772_v35, 0.0 }
 0x1de   :  { %1571 = vpow2.f32 %v922_v36 }
 0x1e9   :  { %v1570_v38 = vpop.eup %1569 }
 0x1ea   :  { %v1361_v39 = vadd.f32 -1.0, %v1570_v38 }
 0x1eb   :  { %v1572_v40 = vpop.eup %1571 }
 0x1ec   :  { %v932_v41 = vmul.f32 1.6732632, %v1361_v39  ;;  %v1362_v18 = vadd.f32 -1.0, %v1572_v40 }
 0x1ee   :  { %v933_v42 = vmul.f32 1.6732632, %v1362_v18  ;;  %v936_v21 = vsel %vm916_vm6, %v770_v31, %v932_v41  ;;  %v1581_v31 = vld [vmem:[#allocation7] ss:$4 sm:$0x1f] }
 0x1ef   :  { %v940_v45 = vmul.f32 1.050701, %v936_v21  ;;  %v103_v32 = vrot.slane %v1581_v31, %v102_v28 }
 0x1f0   :  { %v937_v43 = vsel %vm917_vm7, %v772_v35, %v933_v42 }
 0x1f1   :  { %v941_v44 = vmul.f32 1.050701, %v937_v43  ;;  %v322_v36 = vadd.f32 %v1741_v37, %v103_v32  ;;  %v1265_v37 = vld [vmem:[%s1899_s3 + $0xb8] sm:$0xff] }
 0x1f3   :  { %1072 = vmatprep.mubr.f32.mxu1 %v941_v44  ;;  %v1264_v44 = vld [vmem:[%s1899_s3 + $0xa8] sm:$0xff] }
 0x1f4   :  { %1073 = vmatmul.mubr.f32.vlgmr.msra.gmra.mxu1 %v940_v45  ;;  %v1263_v45 = vld [vmem:[%s1899_s3 + $0x98] sm:$0xff] }
 0x1f5   :  { %1515 = vmatprep.mubr.msk.f32.mxu1 %vm1675_vm1, %v1674_v0  ;;  %1484 = vmatpush3.msra.mxu1 %v1171_v5 }
 0x1f6   :  { %1485 = vmatprep.subr.mxu1 %v1674_v0 }
 0x1f7   :  { %1486 = vmatpush3.msra.mxu1 %v1170_v6 }
 0x1f8   :  { %1487 = vmatprep.subr.mxu1 %v1674_v0 }
 0x1f9   :  { %1488 = vmatpush3.msra.mxu1 %v1169_v7 }
 0x1fa   :  { %1489 = vmatprep.subr.mxu1 %v1674_v0 }
 0x1fb   :  { %1490 = vmatpush3.msra.mxu1 %v1168_v8 }
 0x1fc   :  { %1491 = vmatprep.subr.mxu1 %v1674_v0 }
 0x1fd   :  { %1492 = vmatpush3.msra.mxu1 %v1167_v9 }
 0x1fe   :  { %1493 = vmatprep.subr.mxu1 %v1674_v0 }
 0x1ff   :  { %1494 = vmatpush3.msra.mxu1 %v1166_v10 }
 0x200   :  { %1495 = vmatprep.subr.mxu1 %v1674_v0 }
 0x201   :  { %1496 = vmatpush3.msra.mxu1 %v1165_v11 }
 0x202   :  { %1497 = vmatprep.subr.mxu1 %v1674_v0 }
 0x203   :  { %1498 = vmatpush3.msra.mxu1 %v1164_v12 }
 0x204   :  { %1499 = vmatprep.subr.mxu1 %v1674_v0 }
 0x205   :  { %1500 = vmatpush3.msra.mxu1 %v1163_v13 }
 0x206   :  { %1501 = vmatprep.subr.mxu1 %v1674_v0 }
 0x207   :  { %1502 = vmatpush3.msra.mxu1 %v1162_v14 }
 0x208   :  { %1503 = vmatprep.subr.mxu1 %v1674_v0 }
 0x209   :  { %1504 = vmatpush3.msra.mxu1 %v1161_v15 }
 0x20a   :  { %1505 = vmatprep.subr.mxu1 %v1674_v0 }
 0x20b   :  { %1506 = vmatpush3.msra.mxu1 %v1160_v16 }
 0x20c   :  { %1507 = vmatprep.subr.mxu1 %v1674_v0 }
 0x20d   :  { %1508 = vmatpush3.msra.mxu1 %v1159_v20 }
 0x20e   :  { %1509 = vmatprep.subr.mxu1 %v1674_v0 }
 0x20f   :  { %1510 = vmatpush3.msra.mxu1 %v1158_v23 }
 0x210   :  { %1511 = vmatprep.subr.mxu1 %v1674_v0 }
 0x211   :  { %1512 = vmatpush3.msra.mxu1 %v1157_v24 }
 0x212   :  { %1513 = vmatprep.subr.mxu1 %v1674_v0 }
 0x213   :  { %1514 = vmatpush3.msra.mxu1 %v1156_v25 }
 0x216   :  { %v840_v48 = vpop.f32.mrf.mxu1 }
 0x217   :  { %v841_v49 = vadd.f32 %v840_v48, %v623_v46  ;;  %v911_v50 = vpop.f32.mrf.mxu0  ;;  %v1262_v46 = vld [vmem:[%s1899_s3 + $0x88] sm:$0xff] }
 0x218   :  { %v842_v51 = vpop.f32.mrf.mxu1  ;;  %v1260_v48 = vld [vmem:[%s1899_s3 + $0x68] sm:$0xff] }
 0x219   :  { %v912_v52 = vadd.f32 %v911_v50, %v841_v49  ;;  %v843_v53 = vadd.f32 %v842_v51, %v627_v47  ;;  %v913_v54 = vpop.f32.mrf.mxu0  ;;  %v1261_v47 = vld [vmem:[%s1899_s3 + $0x78] sm:$0xff]  ;;  %v1258_v50 = vld [vmem:[%s1899_s3 + $0x48] sm:$0xff] }
 0x21a   :  { %v1259_v49 = vld [vmem:[%s1899_s3 + $0x58] sm:$0xff] }
 0x21b   :  { %v924_v55 = vmul.f32 1.442695, %v912_v52  ;;  %v914_v56 = vadd.f32 %v913_v54, %v843_v53  ;;  %vm918_vm8 = vcmp.gt.f32.partialorder %v912_v52, 0.0  ;;  %v1257_v51 = vld [vmem:[%s1899_s3 + $0x38] sm:$0xff]  ;;  %v1254_v54 = vld [vmem:[%s1899_s3 + $0x8] sm:$0xff] }
 0x21c   :  { %v1255_v53 = vld [vmem:[%s1899_s3 + $0x18] sm:$0xff] }
 0x21d   :  { %1573 = vpow2.f32 %v924_v55  ;;  %v926_v57 = vmul.f32 1.442695, %v914_v56  ;;  %vm919_vm9 = vcmp.gt.f32.partialorder %v914_v56, 0.0  ;;  %v1366_v55 = vld [vmem:[#allocation7 + $0x2] ss:$0 sm:$0xff] }
 0x21f   :  { %1575 = vpow2.f32 %v926_v57 }
 0x22a   :  { %v1574_v59 = vpop.eup %1573 }
 0x22b   :  { %v1363_v60 = vadd.f32 -1.0, %v1574_v59 }
 0x22c   :  { %v1576_v62 = vpop.eup %1575 }
 0x22d   :  { %v934_v63 = vmul.f32 1.6732632, %v1363_v60  ;;  %v1364_v19 = vadd.f32 -1.0, %v1576_v62 }
 0x22f   :  { %v935_v1 = vmul.f32 1.6732632, %v1364_v19  ;;  %v938_v22 = vsel %vm918_vm8, %v912_v52, %v934_v63  ;;  %v1256_v52 = vld [vmem:[%s1899_s3 + $0x28] sm:$0xff] }
 0x230   :  { %v942_v4 = vmul.f32 1.050701, %v938_v22 }
 0x231   :  { %v939_v2 = vsel %vm919_vm9, %v914_v56, %v935_v1 }
 0x232   :  { %v943_v3 = vmul.f32 1.050701, %v939_v2  ;;  %v1368_v2 = vld [vmem:[#allocation7 + $0x3] ss:$0 sm:$0xff] }
 0x234   :  { %1142 = vmatprep.mubr.f32.mxu0 %v943_v3 }
 0x235   :  { %1143 = vmatmul.mubr.f32.vlgmr.msra.gmra.mxu0 %v942_v4 }
 0x236   :  { %1550 = vmatprep.mubr.msk.f32.mxu0 %vm1675_vm1, %v1674_v0  ;;  %1519 = vmatpush3.msra.mxu0 %v1269_v26 }
 0x237   :  { %1520 = vmatprep.subr.mxu0 %v1674_v0 }
 0x238   :  { %1521 = vmatpush3.msra.mxu0 %v1268_v27 }
 0x239   :  { %1522 = vmatprep.subr.mxu0 %v1674_v0 }
 0x23a   :  { %1523 = vmatpush3.msra.mxu0 %v1267_v58 }
 0x23b   :  { %1524 = vmatprep.subr.mxu0 %v1674_v0 }
 0x23c   :  { %1525 = vmatpush3.msra.mxu0 %v1266_v17 }
 0x23d   :  { %1526 = vmatprep.subr.mxu0 %v1674_v0 }
 0x23e   :  { %1527 = vmatpush3.msra.mxu0 %v1265_v37 }
 0x23f   :  { %1528 = vmatprep.subr.mxu0 %v1674_v0 }
 0x240   :  { %1529 = vmatpush3.msra.mxu0 %v1264_v44 }
 0x241   :  { %1530 = vmatprep.subr.mxu0 %v1674_v0 }
 0x242   :  { %1531 = vmatpush3.msra.mxu0 %v1263_v45 }
 0x243   :  { %1532 = vmatprep.subr.mxu0 %v1674_v0 }
 0x244   :  { %1533 = vmatpush3.msra.mxu0 %v1262_v46 }
 0x245   :  { %1534 = vmatprep.subr.mxu0 %v1674_v0 }
 0x246   :  { %1535 = vmatpush3.msra.mxu0 %v1261_v47 }
 0x247   :  { %1536 = vmatprep.subr.mxu0 %v1674_v0 }
 0x248   :  { %1537 = vmatpush3.msra.mxu0 %v1260_v48 }
 0x249   :  { %1538 = vmatprep.subr.mxu0 %v1674_v0 }
 0x24a   :  { %1539 = vmatpush3.msra.mxu0 %v1259_v49 }
 0x24b   :  { %1540 = vmatprep.subr.mxu0 %v1674_v0 }
 0x24c   :  { %1541 = vmatpush3.msra.mxu0 %v1258_v50 }
 0x24d   :  { %1542 = vmatprep.subr.mxu0 %v1674_v0 }
 0x24e   :  { %1543 = vmatpush3.msra.mxu0 %v1257_v51 }
 0x24f   :  { %1544 = vmatprep.subr.mxu0 %v1674_v0 }
 0x250   :  { %1545 = vmatpush3.msra.mxu0 %v1256_v52 }
 0x251   :  { %1546 = vmatprep.subr.mxu0 %v1674_v0 }
 0x252   :  { %1547 = vmatpush3.msra.mxu0 %v1255_v53 }
 0x253   :  { %1548 = vmatprep.subr.mxu0 %v1674_v0 }
 0x254   :  { %1549 = vmatpush3.msra.mxu0 %v1254_v54 }
 0x2b4   :  { %v1404_v61 = vpop.f32.mrf.mxu1 }
 0x2b6   :  { %v1405_v29 = vpop.f32.mrf.mxu1 }
 0x2b7   :  { %v1406_v34 = vadd.f32 %v1405_v29, %v1404_v61 }
 0x2f5   :  { %v1439_v30 = vpop.f32.mrf.mxu0 }
 0x2f7   :  { %v1440_v33 = vpop.f32.mrf.mxu0 }
 0x2f8   :  { %v1441_v35 = vadd.f32 %v1440_v33, %v1439_v30 }
 0x2fa   :  { %v1145_v38 = vadd.f32 %v1441_v35, %v1406_v34 }
 0x2fc   :  { %v1148_v39 = vadd.f32 %v1145_v38, %v322_v36 }
 0x2fe   :  { %v1150_v40 = vmul.f32 1.442695, %v1148_v39  ;;  %vm1149_vm10 = vcmp.gt.f32.partialorder %v1148_v39, 0.0 }
 0x300   :  { %1577 = vpow2.f32 %v1150_v40 }
 0x30d   :  { %v1578_v41 = vpop.eup %1577 }
 0x30e   :  { %v1365_v18 = vadd.f32 -1.0, %v1578_v41 }
 0x310   :  { %v1153_v42 = vmul.f32 1.6732632, %v1365_v18 }
 0x312   :  { %v1154_v21 = vsel %vm1149_vm10, %v1148_v39, %v1153_v42 }
 0x313   :  { %v1155_v43 = vmul.f32 1.050701, %v1154_v21 }
 0x315   :  { %1516 = vmatmul.mubr.f32.vlgmr.msra.gmra.mxu1 %v1155_v43 }
 0x3d5   :  { %v1243_v56 = vpop.f32.mrf.mxu1 }
 0x3d6   :  { %v1244_v57 = vadd.f32 %v1366_v55, %v1243_v56 }
 0x3d7   :  { %v1517_v59 = vpop.f32.mrf.mxu1 }
 0x3d8   :  { %v1248_v60 = vmul.f32 1.442695, %v1244_v57  ;;  %vm1247_vm11 = vcmp.gt.f32.partialorder %v1244_v57, 0.0 }
 0x3da   :  { %1579 = vpow2.f32 %v1248_v60 }
 0x3e7   :  { %v1580_v62 = vpop.eup %1579 }
 0x3e8   :  { %v1367_v63 = vadd.f32 -1.0, %v1580_v62 }
 0x3ea   :  { %v1251_v19 = vmul.f32 1.6732632, %v1367_v63 }
 0x3ec   :  { %v1252_v1 = vsel %vm1247_vm11, %v1244_v57, %v1251_v19 }
 0x3ed   :  { %v1253_v22 = vmul.f32 1.050701, %v1252_v1 }
 0x3ef   :  { %1551 = vmatmul.mubr.f32.vlgmr.msra.gmra.mxu0 %v1253_v22 }
 0x4af   :  { %v1341_v3 = vpop.f32.mrf.mxu0 }
 0x4b0   :  { %v1342_v4 = vadd.f32 %v1368_v2, %v1341_v3 }
 0x4b1   :  { %v1552_v5 = vpop.f32.mrf.mxu0 }
 0x4b2   :  { %1346 = vst.msk [vmem:[%s1901_s5] sm:$0xff] %vm1345_vm12, %v1342_v4 }
 0x4b3   :  { %1351 = vsyncpa [#allocation3], 1 }
 0x4b4   :  { %1352 = vsyncpa [#allocation5], 1 }
 0x4b5   :  { %1353 = vsyncpa [#allocation8], 1 }

</bundles_post_ra>
